<compile_context>
chip_gen: v5e
topology: v5e:2x2
jax: 0.10.0
libtpu: 0.0.40
codegen_flags: <defaults>
</compile_context>

<pallas_src>
import functools

import jax
import jax.numpy as jnp
import numpy as np
from jax.experimental import pallas as pl
from jax.experimental.pallas import tpu as pltpu


def _round_up(x, m):
    return (x + m - 1) // m * m


# ----------------------------------------------------------------------------
# Fused decoder-stage Pallas kernel
# ----------------------------------------------------------------------------
def _make_decoder_kernel(Cf_p, Wp, Lpad, sigmoid):
    f32, bf16 = jnp.float32, jnp.bfloat16

    def kernel(dec_ref, enc_ref, wup_ref, bup_ref,
               w1_ref, s1_ref, t1_ref,
               w2_ref, s2_ref, t2_ref,
               w3_ref, s3_ref, t3_ref,
               w4_ref, t4_ref, imask_ref,
               d_out_ref, o_out_ref, act_ref):
        imask = imask_ref[...]                                    # (1, Lpad): 1 on valid interior

        # ---- ConvTranspose2d(k=2, s=2): dec was pre-dilated onto the padded canvas by
        # the wrapper; 4 parity taps = XLU lane rolls, fused into ONE bf16 MXU matmul.
        dec = dec_ref[0]                                          # (Cin_p, Lpad) f32
        utaps = [dec if (kh == 0 and kw == 0)
                 else pltpu.roll(dec, kh * Wp + kw, axis=1)
                 for kh in range(2) for kw in range(2)]
        up_in = jnp.concatenate(utaps, axis=0).astype(bf16)       # (4*Cin_p, Lpad)
        up = jnp.dot(wup_ref[...], up_in, preferred_element_type=f32)  # (Cf_p, Lpad)
        act_ref[0:Cf_p, :] = (up + bup_ref[...]) * imask          # bias only on valid pixels

        # ---- torch.cat((up, enc), dim=1): skip already in canvas layout -> one store.
        act_ref[Cf_p:2 * Cf_p, :] = enc_ref[0]

        def conv3x3(cin_p, w_ref, scale, shift):
            """3x3/pad=1 conv over the padded canvas: 9 rolled taps stacked along the
            sublane dim, one bf16 matmul (contraction 9*cin_p); output is produced
            directly in canvas layout (no pad re-insertion / seam compaction)."""
            x = act_ref[0:cin_p, :]                               # (cin_p, Lpad) f32
            taps = []
            for dy in range(3):
                for dx in range(3):
                    s = (1 - dy) * Wp + (1 - dx)                  # out[p] reads canvas[p - s]
                    taps.append(x if s == 0 else pltpu.roll(x, s % Lpad, axis=1))
            xs = jnp.concatenate(taps, axis=0).astype(bf16)       # (9*cin_p, Lpad), one cast
            y = jnp.dot(w_ref[...], xs, preferred_element_type=f32)
            return y * scale + shift                              # (cout_p, Lpad) f32

        # ---- decoder trunk: ConvBlock(2Cf -> Cf), ConvBlock(Cf -> Cf)
        y1 = jnp.maximum(conv3x3(2 * Cf_p, w1_ref, s1_ref[...], t1_ref[...]), 0.0) * imask
        act_ref[0:Cf_p, :] = y1
        y2 = jnp.maximum(conv3x3(Cf_p, w2_ref, s2_ref[...], t2_ref[...]), 0.0) * imask
        d_out_ref[0] = y2                                         # decoder feature (canvas slab)
        act_ref[0:Cf_p, :] = y2

        # ---- side head: ConvBlock(Cf -> 16), Conv3x3(16 -> OutC), sigmoid
        y3 = jnp.maximum(conv3x3(Cf_p, w3_ref, s3_ref[...], t3_ref[...]), 0.0) * imask
        act_ref[0:16, :] = y3
        y4 = conv3x3(16, w4_ref, 1.0, t4_ref[...])
        if sigmoid:
            y4 = jax.nn.sigmoid(y4)
        o_out_ref[0] = y4

    return kernel


# ----------------------------------------------------------------------------
# Parameter / input re-layout helpers (tiny trace-time XLA ops)
# ----------------------------------------------------------------------------
def _pack_conv3x3_weight(w, segments, cin_canvas, cout_p):
    """(cout, cin, 3, 3) torch weight -> (cout_p, 9*cin_canvas) bf16; column index
    (dy*3+dx)*cin_canvas + canvas_channel.  `segments` = [(torch_start, canvas_start,
    length)] maps torch input channels to canvas rows (padding columns stay zero)."""
    cout = w.shape[0]
    wk = jnp.zeros((cout_p, 3, 3, cin_canvas), jnp.float32)
    for t0, c0, ln in segments:
        wk = wk.at[:cout, :, :, c0:c0 + ln].set(
            jnp.transpose(w[:, t0:t0 + ln].astype(jnp.float32), (0, 2, 3, 1)))
    return wk.reshape(cout_p, 9 * cin_canvas).astype(jnp.bfloat16)


def _fold_bn(p, segments, cin_canvas, cout_p):
    w, b, gamma, beta, mean, var = p
    cout = w.shape[0]
    inv = gamma / jnp.sqrt(var + 1e-5)
    wf = _pack_conv3x3_weight(w, segments, cin_canvas, cout_p)
    scale = jnp.zeros((cout_p, 1), jnp.float32).at[:cout, 0].set(inv)
    shift = jnp.zeros((cout_p, 1), jnp.float32).at[:cout, 0].set(beta + (b - mean) * inv)
    return wf, scale, shift


def _to_canvas(x_nchw, c_pad, Lpad):
    """NCHW -> channel zero-pad -> +1 spatial zero ring -> flattened canvas lanes
    zero-padded to Lpad.  Pure layout plumbing (pads/reshapes on tiny arrays)."""
    N, C, H, W = x_nchw.shape
    x = jnp.pad(x_nchw.astype(jnp.float32), ((0, 0), (0, c_pad - C), (1, 1), (1, 1)))
    x = x.reshape(N, c_pad, (H + 2) * (W + 2))
    return jnp.pad(x, ((0, 0), (0, 0), (0, Lpad - (H + 2) * (W + 2))))


# ----------------------------------------------------------------------------
# Decoder_block forward (inputs / outputs in torch NCHW convention)
# ----------------------------------------------------------------------------
@functools.partial(jax.jit, static_argnames="sigmoid")
def decoder_block_forward(dec_nchw, enc_nchw, params, sigmoid=True):
    N, Cin, Hd, Wd = dec_nchw.shape
    Nb, Cf, Hs, Ws = enc_nchw.shape
    assert Nb == N and Hs == 2 * Hd and Ws == 2 * Wd
    OutC = params["side2_w"].shape[0]

    Hp, Wp = Hs + 2, Ws + 2
    Lpad = _round_up(Hp * Wp, 128)
    Cin_p = max(_round_up(Cin, 8), 8)
    Cf_p = max(_round_up(Cf, 8), 8)
    OutC_p = max(_round_up(OutC, 8), 8)
    Cmax_p = 2 * Cf_p                              # >= 16 canvas channel rows

    # ---- inputs: pre-dilate `dec` (stride-2 pixel positions) and pre-place `enc`
    # onto the zero-padded canvas layout (free pads/reshapes, no transposes).
    dec_dil = jnp.zeros((N, Cin, Hd, 2, Wd, 2), jnp.float32)
    dec_dil = dec_dil.at[:, :, :, 0, :, 0].set(dec_nchw.astype(jnp.float32))
    dec_dil = dec_dil.reshape(N, Cin, Hs, Ws)
    dec_can = _to_canvas(dec_dil, Cin_p, Lpad)     # (N, Cin_p, Lpad)
    enc_can = _to_canvas(enc_nchw, Cf_p, Lpad)     # (N, Cf_p, Lpad)

    # ---- parameters (re-laid out once per trace); BN folded into scale/shift.
    wup = jnp.zeros((Cf_p, 2, 2, Cin_p), jnp.float32)
    wup = wup.at[:Cf, :, :, :Cin].set(
        jnp.transpose(params["up_w"].astype(jnp.float32), (1, 2, 3, 0)))
    wup = wup.reshape(Cf_p, 4 * Cin_p).astype(jnp.bfloat16)
    bup = jnp.zeros((Cf_p, 1), jnp.float32).at[:Cf, 0].set(params["up_b"])

    w1, s1, t1 = _fold_bn(params["dec1"], [(0, 0, Cf), (Cf, Cf_p, Cf)], 2 * Cf_p, Cf_p)
    w2, s2, t2 = _fold_bn(params["dec2"], [(0, 0, Cf)], Cf_p, Cf_p)
    w3, s3, t3 = _fold_bn(params["side1"], [(0, 0, Cf)], Cf_p, 16)
    w4 = _pack_conv3x3_weight(params["side2_w"], [(0, 0, 16)], 16, OutC_p)
    t4 = jnp.zeros((OutC_p, 1), jnp.float32).at[:OutC, 0].set(params["side2_b"])

    # Valid-interior mask (zeros on pad ring, seam columns and the lane-padding tail):
    # the only routing constant left, 4*Lpad bytes.
    im = np.zeros((1, Lpad), np.float32)
    idx = (np.arange(1, Hs + 1)[:, None] * Wp + np.arange(1, Ws + 1)[None, :]).reshape(-1)
    im[0, idx] = 1.0
    imask = jnp.asarray(im)

    operands = (dec_can, enc_can, wup, bup, w1, s1, t1, w2, s2, t2,
                w3, s3, t3, w4, t4, imask)

    def batched(arr):
        nd = arr.ndim
        return pl.BlockSpec((1,) + tuple(arr.shape[1:]),
                            lambda b, _nd=nd: (b,) + (0,) * (_nd - 1))

    def shared(arr):
        nd = arr.ndim
        return pl.BlockSpec(tuple(arr.shape), lambda b, _nd=nd: (0,) * _nd)

    in_specs = [batched(dec_can), batched(enc_can)] + [shared(x) for x in operands[2:]]
    out_specs = (pl.BlockSpec((1, Cf_p, Lpad), lambda b: (b, 0, 0)),
                 pl.BlockSpec((1, OutC_p, Lpad), lambda b: (b, 0, 0)))
    out_shape = (jax.ShapeDtypeStruct((N, Cf_p, Lpad), jnp.float32),
                 jax.ShapeDtypeStruct((N, OutC_p, Lpad), jnp.float32))

    # scheduler hint: only the real (bf16) matmuls remain
    flops = N * Lpad * 2 * (Cf_p * 4 * Cin_p + Cf_p * 9 * 2 * Cf_p + Cf_p * 9 * Cf_p
                            + 16 * 9 * Cf_p + OutC_p * 9 * 16)
    bytes_accessed = int(sum(int(np.prod(x.shape)) * x.dtype.itemsize for x in operands)
                         + N * (Cf_p + OutC_p) * Lpad * 4)
    cost = pl.CostEstimate(flops=int(flops),
                           transcendentals=int(N * OutC_p * Lpad) if sigmoid else 0,
                           bytes_accessed=bytes_accessed)

    kernel = _make_decoder_kernel(Cf_p, Wp, Lpad, sigmoid)

    d_can, o_can = pl.pallas_call(
        kernel,
        out_shape=out_shape,
        grid=(N,),
        in_specs=in_specs,
        out_specs=out_specs,
        scratch_shapes=[pltpu.VMEM((Cmax_p, Lpad), jnp.float32)],
        compiler_params=pltpu.CompilerParams(dimension_semantics=("parallel",)),
        cost_estimate=cost,
    )(*operands)

    # Output compaction (drop pad ring / seam columns / channel padding): tiny
    # wrapper-side strided slice on the lane-dense canvas slab.
    def compact(can, c):
        x = can[:, :c, :Hp * Wp].reshape(N, c, Hp, Wp)
        return x[:, :, 1:Hs + 1, 1:Ws + 1]

    return compact(d_can, Cf), compact(o_can, OutC)


# ----------------------------------------------------------------------------
# Pure-JAX f32 reference (independent conv lowering via lax.conv) for validation
# ----------------------------------------------------------------------------
def _ref_conv3x3(x, w, b):
    wr = jnp.transpose(w, (2, 3, 1, 0))            # (Cout,Cin,kh,kw) -> HWIO
    y = jax.lax.conv_general_dilated(
        x, wr, window_strides=(1, 1), padding=((1, 1), (1, 1)),
        dimension_numbers=("NHWC", "HWIO", "NHWC"))
    return y + b


def _ref_conv_block(x, p):
    w, b, gamma, beta, mean, var = p
    y = _ref_conv3x3(x, w, b)
    y = (y - mean) / jnp.sqrt(var + 1e-5) * gamma + beta
    return jnp.maximum(y, 0.0)


def _ref_forward(dec_nchw, enc_nchw, params, sigmoid=True):
    dec = jnp.transpose(dec_nchw, (0, 2, 3, 1))
    enc = jnp.transpose(enc_nchw, (0, 2, 3, 1))
    N, H, W, Cin = dec.shape
    Cout = params["up_w"].shape[1]
    # out[n, 2h+kh, 2w+kw, co] = sum_ci x[n,h,w,ci] * W[ci,co,kh,kw] + b[co]
    y = jnp.einsum("nhwi,iokl->nhklwo", dec, params["up_w"])
    y = jnp.transpose(y, (0, 1, 2, 4, 3, 5)).reshape(N, 2 * H, 2 * W, Cout) + params["up_b"]
    d = jnp.concatenate([y, enc], axis=-1)
    d = _ref_conv_block(d, params["dec1"])
    d = _ref_conv_block(d, params["dec2"])
    o = _ref_conv_block(d, params["side1"])
    o = _ref_conv3x3(o, params["side2_w"], params["side2_b"])
    if sigmoid:
        o = jax.nn.sigmoid(o)
    return jnp.transpose(d, (0, 3, 1, 2)), jnp.transpose(o, (0, 3, 1, 2))


# ----------------------------------------------------------------------------
# Deterministic parameter construction
# ----------------------------------------------------------------------------
def _make_conv_block_params(key, cin, cout):
    k = jax.random.split(key, 6)
    w = jax.random.normal(k[0], (cout, cin, 3, 3), jnp.float32) * 0.2
    b = jax.random.normal(k[1], (cout,), jnp.float32) * 0.1
    gamma = jax.random.uniform(k[2], (cout,), jnp.float32, 0.5, 1.5)
    beta = jax.random.normal(k[3], (cout,), jnp.float32) * 0.1
    mean = jax.random.normal(k[4], (cout,), jnp.float32) * 0.1
    var = jax.random.uniform(k[5], (cout,), jnp.float32, 0.5, 1.5)
    return (w, b, gamma, beta, mean, var)


def make_params(key, in_features, out_features, out_channels):
    keys = jax.random.split(key, 6)
    return {
        "up_w": jax.random.normal(keys[0], (in_features, out_features, 2, 2), jnp.float32) * 0.2,
        "up_b": jax.random.normal(keys[1], (out_features,), jnp.float32) * 0.1,
        "dec1": _make_conv_block_params(keys[2], out_features * 2, out_features),
        "dec2": _make_conv_block_params(keys[3], out_features, out_features),
        "side1": _make_conv_block_params(keys[4], out_features, 16),
        "side2_w": jax.random.normal(keys[5], (out_channels, 16, 3, 3), jnp.float32) * 0.2,
        "side2_b": jnp.zeros((out_channels,), jnp.float32) + 0.05,
    }


if __name__ == "__main__":
    # Decoder_block(in_features=8, out_features=4, out_channels=1)
    B, IN_F, OUT_F, OUT_CH = 2, 8, 4, 1
    H_DEC = W_DEC = 8            # decoder feature spatial (before 2x upsample)
    H_ENC = W_ENC = 16           # encoder skip / output spatial

    root = jax.random.PRNGKey(0)
    k_dec, k_enc, k_par = jax.random.split(root, 3)
    dec_feature = jax.random.normal(k_dec, (B, IN_F, H_DEC, W_DEC), jnp.float32)   # NCHW
    enc_feature = jax.random.normal(k_enc, (B, OUT_F, H_ENC, W_ENC), jnp.float32)  # NCHW
    params = make_params(k_par, IN_F, OUT_F, OUT_CH)

    d_out, o_out = decoder_block_forward(dec_feature, enc_feature, params, sigmoid=True)
    jax.block_until_ready((d_out, o_out))

    # sanity: shapes match torch semantics
    assert d_out.shape == (B, OUT_F, H_ENC, W_ENC)
    assert o_out.shape == (B, OUT_CH, H_ENC, W_ENC)

    # correctness vs. independent pure-f32 JAX reference.
    # (kernel feeds bf16 operands to the MXU with f32 accumulation -> loosened tolerance)
    d_ref, o_ref = _ref_forward(dec_feature, enc_feature, params, sigmoid=True)
    np.testing.assert_allclose(np.asarray(d_out), np.asarray(d_ref), rtol=5e-2, atol=1e-1)
    np.testing.assert_allclose(np.asarray(o_out), np.asarray(o_ref), rtol=5e-2, atol=5e-2)

    print("KERNEL_OK")
</pallas_src>

<mosaic_0001>
module attributes {stable_mosaic.version = 11 : i64} {
  func.func @kernel(%arg0: i32, %arg1: memref<1x8x384xf32, #tpu.memory_space<vmem>>, %arg2: memref<1x8x384xf32, #tpu.memory_space<vmem>>, %arg3: memref<8x32xbf16, #tpu.memory_space<vmem>>, %arg4: memref<8x1xf32, #tpu.memory_space<vmem>>, %arg5: memref<8x144xbf16, #tpu.memory_space<vmem>>, %arg6: memref<8x1xf32, #tpu.memory_space<vmem>>, %arg7: memref<8x1xf32, #tpu.memory_space<vmem>>, %arg8: memref<8x72xbf16, #tpu.memory_space<vmem>>, %arg9: memref<8x1xf32, #tpu.memory_space<vmem>>, %arg10: memref<8x1xf32, #tpu.memory_space<vmem>>, %arg11: memref<16x72xbf16, #tpu.memory_space<vmem>>, %arg12: memref<16x1xf32, #tpu.memory_space<vmem>>, %arg13: memref<16x1xf32, #tpu.memory_space<vmem>>, %arg14: memref<8x144xbf16, #tpu.memory_space<vmem>>, %arg15: memref<8x1xf32, #tpu.memory_space<vmem>>, %arg16: memref<1x384xf32, #tpu.memory_space<vmem>>, %arg17: memref<1x8x384xf32, #tpu.memory_space<vmem>>, %arg18: memref<1x8x384xf32, #tpu.memory_space<vmem>>, %arg19: memref<16x384xf32, #tpu.memory_space<vmem>>) attributes {dimension_semantics = [#tpu.dimension_semantics<parallel>], iteration_bounds = array<i64: 2>, scalar_prefetch = 0 : i64, scratch_operands = 1 : i64, tpu.core_type = #tpu.core_type<tc>, window_params = [{transform_indices = @transform_0, window_bounds = array<i64: 1, 8, 384>}, {transform_indices = @transform_1, window_bounds = array<i64: 1, 8, 384>}, {pipeline_mode = #tpu.pipeline_mode<synchronous>, transform_indices = @transform_2, window_bounds = array<i64: 8, 32>}, {pipeline_mode = #tpu.pipeline_mode<synchronous>, transform_indices = @transform_3, window_bounds = array<i64: 8, 1>}, {pipeline_mode = #tpu.pipeline_mode<synchronous>, transform_indices = @transform_4, window_bounds = array<i64: 8, 144>}, {pipeline_mode = #tpu.pipeline_mode<synchronous>, transform_indices = @transform_5, window_bounds = array<i64: 8, 1>}, {pipeline_mode = #tpu.pipeline_mode<synchronous>, transform_indices = @transform_6, window_bounds = array<i64: 8, 1>}, {pipeline_mode = #tpu.pipeline_mode<synchronous>, transform_indices = @transform_7, window_bounds = array<i64: 8, 72>}, {pipeline_mode = #tpu.pipeline_mode<synchronous>, transform_indices = @transform_8, window_bounds = array<i64: 8, 1>}, {pipeline_mode = #tpu.pipeline_mode<synchronous>, transform_indices = @transform_9, window_bounds = array<i64: 8, 1>}, {pipeline_mode = #tpu.pipeline_mode<synchronous>, transform_indices = @transform_10, window_bounds = array<i64: 16, 72>}, {pipeline_mode = #tpu.pipeline_mode<synchronous>, transform_indices = @transform_11, window_bounds = array<i64: 16, 1>}, {pipeline_mode = #tpu.pipeline_mode<synchronous>, transform_indices = @transform_12, window_bounds = array<i64: 16, 1>}, {pipeline_mode = #tpu.pipeline_mode<synchronous>, transform_indices = @transform_13, window_bounds = array<i64: 8, 144>}, {pipeline_mode = #tpu.pipeline_mode<synchronous>, transform_indices = @transform_14, window_bounds = array<i64: 8, 1>}, {pipeline_mode = #tpu.pipeline_mode<synchronous>, transform_indices = @transform_15, window_bounds = array<i64: 1, 384>}, {transform_indices = @transform_16, window_bounds = array<i64: 1, 8, 384>}, {transform_indices = @transform_17, window_bounds = array<i64: 1, 8, 384>}]} {
    %c0 = arith.constant 0 : index
    %c0_0 = arith.constant 0 : index
    %0 = vector.load %arg16[%c0, %c0_0] : memref<1x384xf32, #tpu.memory_space<vmem>>, vector<1x384xf32>
    %c0_1 = arith.constant 0 : index
    %c0_2 = arith.constant 0 : index
    %c0_3 = arith.constant 0 : index
    %1 = vector.load %arg1[%c0_1, %c0_2, %c0_3] : memref<1x8x384xf32, #tpu.memory_space<vmem>>, vector<1x8x384xf32>
    %2 = vector.shape_cast %1 : vector<1x8x384xf32> to vector<8x384xf32>
    %c1_i32 = arith.constant 1 : i32
    %3 = tpu.dynamic_rotate %2 by %c1_i32 dim 1 : vector<8x384xf32>, i32 -> vector<8x384xf32>
    %c18_i32 = arith.constant 18 : i32
    %4 = tpu.dynamic_rotate %2 by %c18_i32 dim 1 : vector<8x384xf32>, i32 -> vector<8x384xf32>
    %c19_i32 = arith.constant 19 : i32
    %5 = tpu.dynamic_rotate %2 by %c19_i32 dim 1 : vector<8x384xf32>, i32 -> vector<8x384xf32>
    %6 = tpu.concatenate %2, %3, %4, %5 in 0 : vector<8x384xf32>, vector<8x384xf32>, vector<8x384xf32>, vector<8x384xf32> -> vector<32x384xf32>
    %7 = arith.truncf %6 : vector<32x384xf32> to vector<32x384xbf16>
    %c0_4 = arith.constant 0 : index
    %c0_5 = arith.constant 0 : index
    %8 = vector.load %arg3[%c0_4, %c0_5] : memref<8x32xbf16, #tpu.memory_space<vmem>>, vector<8x32xbf16>
    %cst = arith.constant dense<0.000000e+00> : vector<8x384xf32>
    %9 = tpu.matmul %8, %7, %cst {dimension_numbers = #tpu.dot_dimension_numbers<[1], [0], [0], [1], [0, 0, 1, 1], [], []>} : vector<8x32xbf16>, vector<32x384xbf16>, vector<8x384xf32> -> vector<8x384xf32>
    %c0_6 = arith.constant 0 : index
    %c0_7 = arith.constant 0 : index
    %10 = vector.load %arg4[%c0_6, %c0_7] : memref<8x1xf32, #tpu.memory_space<vmem>>, vector<8x1xf32>
    %11 = vector.broadcast %10 : vector<8x1xf32> to vector<8x384xf32>
    %12 = arith.addf %9, %11 : vector<8x384xf32>
    %13 = vector.broadcast %0 : vector<1x384xf32> to vector<8x384xf32>
    %14 = arith.mulf %12, %13 : vector<8x384xf32>
    %c0_8 = arith.constant 0 : index
    %c0_9 = arith.constant 0 : index
    %15 = vector.load %arg19[%c0_8, %c0_9] : memref<16x384xf32, #tpu.memory_space<vmem>>, vector<8x384xf32>
    tpu.vector_store %arg19[%c0_8, %c0_9], %14 {strides = array<i32>} : memref<16x384xf32, #tpu.memory_space<vmem>>, vector<8x384xf32>,
    %c0_10 = arith.constant 0 : index
    %c0_11 = arith.constant 0 : index
    %c0_12 = arith.constant 0 : index
    %16 = vector.load %arg2[%c0_10, %c0_11, %c0_12] : memref<1x8x384xf32, #tpu.memory_space<vmem>>, vector<1x8x384xf32>
    %17 = vector.shape_cast %16 : vector<1x8x384xf32> to vector<8x384xf32>
    %c8 = arith.constant 8 : index
    %c0_13 = arith.constant 0 : index
    %18 = vector.load %arg19[%c8, %c0_13] : memref<16x384xf32, #tpu.memory_space<vmem>>, vector<8x384xf32>
    tpu.vector_store %arg19[%c8, %c0_13], %17 {strides = array<i32>} : memref<16x384xf32, #tpu.memory_space<vmem>>, vector<8x384xf32>,
    %c0_14 = arith.constant 0 : index
    %c0_15 = arith.constant 0 : index
    %19 = vector.load %arg6[%c0_14, %c0_15] : memref<8x1xf32, #tpu.memory_space<vmem>>, vector<8x1xf32>
    %c0_16 = arith.constant 0 : index
    %c0_17 = arith.constant 0 : index
    %20 = vector.load %arg7[%c0_16, %c0_17] : memref<8x1xf32, #tpu.memory_space<vmem>>, vector<8x1xf32>
    %c0_18 = arith.constant 0 : index
    %c0_19 = arith.constant 0 : index
    %21 = vector.load %arg19[%c0_18, %c0_19] : memref<16x384xf32, #tpu.memory_space<vmem>>, vector<16x384xf32>
    %c19_i32_20 = arith.constant 19 : i32
    %22 = tpu.dynamic_rotate %21 by %c19_i32_20 dim 1 : vector<16x384xf32>, i32 -> vector<16x384xf32>
    %c18_i32_21 = arith.constant 18 : i32
    %23 = tpu.dynamic_rotate %21 by %c18_i32_21 dim 1 : vector<16x384xf32>, i32 -> vector<16x384xf32>
    %c17_i32 = arith.constant 17 : i32
    %24 = tpu.dynamic_rotate %21 by %c17_i32 dim 1 : vector<16x384xf32>, i32 -> vector<16x384xf32>
    %c1_i32_22 = arith.constant 1 : i32
    %25 = tpu.dynamic_rotate %21 by %c1_i32_22 dim 1 : vector<16x384xf32>, i32 -> vector<16x384xf32>
    %c383_i32 = arith.constant 383 : i32
    %26 = tpu.dynamic_rotate %21 by %c383_i32 dim 1 : vector<16x384xf32>, i32 -> vector<16x384xf32>
    %c367_i32 = arith.constant 367 : i32
    %27 = tpu.dynamic_rotate %21 by %c367_i32 dim 1 : vector<16x384xf32>, i32 -> vector<16x384xf32>
    %c366_i32 = arith.constant 366 : i32
    %28 = tpu.dynamic_rotate %21 by %c366_i32 dim 1 : vector<16x384xf32>, i32 -> vector<16x384xf32>
    %c365_i32 = arith.constant 365 : i32
    %29 = tpu.dynamic_rotate %21 by %c365_i32 dim 1 : vector<16x384xf32>, i32 -> vector<16x384xf32>
    %30 = tpu.concatenate %22, %23, %24, %25, %21, %26, %27, %28, %29 in 0 : vector<16x384xf32>, vector<16x384xf32>, vector<16x384xf32>, vector<16x384xf32>, vector<16x384xf32>, vector<16x384xf32>, vector<16x384xf32>, vector<16x384xf32>, vector<16x384xf32> -> vector<144x384xf32>
    %31 = arith.truncf %30 : vector<144x384xf32> to vector<144x384xbf16>
    %c0_23 = arith.constant 0 : index
    %c0_24 = arith.constant 0 : index
    %32 = vector.load %arg5[%c0_23, %c0_24] : memref<8x144xbf16, #tpu.memory_space<vmem>>, vector<8x144xbf16>
    %cst_25 = arith.constant dense<0.000000e+00> : vector<8x384xf32>
    %33 = tpu.matmul %32, %31, %cst_25 {dimension_numbers = #tpu.dot_dimension_numbers<[1], [0], [0], [1], [0, 0, 1, 1], [], []>} : vector<8x144xbf16>, vector<144x384xbf16>, vector<8x384xf32> -> vector<8x384xf32>
    %34 = vector.broadcast %19 : vector<8x1xf32> to vector<8x384xf32>
    %35 = arith.mulf %33, %34 : vector<8x384xf32>
    %36 = vector.broadcast %20 : vector<8x1xf32> to vector<8x384xf32>
    %37 = arith.addf %35, %36 : vector<8x384xf32>
    %cst_26 = arith.constant 0.000000e+00 : f32
    %38 = vector.broadcast %cst_26 : f32 to vector<8x384xf32>
    %39 = arith.maximumf %37, %38 : vector<8x384xf32>
    %40 = vector.broadcast %0 : vector<1x384xf32> to vector<8x384xf32>
    %41 = arith.mulf %39, %40 : vector<8x384xf32>
    %c0_27 = arith.constant 0 : index
    %c0_28 = arith.constant 0 : index
    %42 = vector.load %arg19[%c0_27, %c0_28] : memref<16x384xf32, #tpu.memory_space<vmem>>, vector<8x384xf32>
    tpu.vector_store %arg19[%c0_27, %c0_28], %41 {strides = array<i32>} : memref<16x384xf32, #tpu.memory_space<vmem>>, vector<8x384xf32>,
    %c0_29 = arith.constant 0 : index
    %c0_30 = arith.constant 0 : index
    %43 = vector.load %arg9[%c0_29, %c0_30] : memref<8x1xf32, #tpu.memory_space<vmem>>, vector<8x1xf32>
    %c0_31 = arith.constant 0 : index
    %c0_32 = arith.constant 0 : index
    %44 = vector.load %arg10[%c0_31, %c0_32] : memref<8x1xf32, #tpu.memory_space<vmem>>, vector<8x1xf32>
    %c0_33 = arith.constant 0 : index
    %c0_34 = arith.constant 0 : index
    %45 = vector.load %arg19[%c0_33, %c0_34] : memref<16x384xf32, #tpu.memory_space<vmem>>, vector<8x384xf32>
    %c19_i32_35 = arith.constant 19 : i32
    %46 = tpu.dynamic_rotate %45 by %c19_i32_35 dim 1 : vector<8x384xf32>, i32 -> vector<8x384xf32>
    %c18_i32_36 = arith.constant 18 : i32
    %47 = tpu.dynamic_rotate %45 by %c18_i32_36 dim 1 : vector<8x384xf32>, i32 -> vector<8x384xf32>
    %c17_i32_37 = arith.constant 17 : i32
    %48 = tpu.dynamic_rotate %45 by %c17_i32_37 dim 1 : vector<8x384xf32>, i32 -> vector<8x384xf32>
    %c1_i32_38 = arith.constant 1 : i32
    %49 = tpu.dynamic_rotate %45 by %c1_i32_38 dim 1 : vector<8x384xf32>, i32 -> vector<8x384xf32>
    %c383_i32_39 = arith.constant 383 : i32
    %50 = tpu.dynamic_rotate %45 by %c383_i32_39 dim 1 : vector<8x384xf32>, i32 -> vector<8x384xf32>
    %c367_i32_40 = arith.constant 367 : i32
    %51 = tpu.dynamic_rotate %45 by %c367_i32_40 dim 1 : vector<8x384xf32>, i32 -> vector<8x384xf32>
    %c366_i32_41 = arith.constant 366 : i32
    %52 = tpu.dynamic_rotate %45 by %c366_i32_41 dim 1 : vector<8x384xf32>, i32 -> vector<8x384xf32>
    %c365_i32_42 = arith.constant 365 : i32
    %53 = tpu.dynamic_rotate %45 by %c365_i32_42 dim 1 : vector<8x384xf32>, i32 -> vector<8x384xf32>
    %54 = tpu.concatenate %46, %47, %48, %49, %45, %50, %51, %52, %53 in 0 : vector<8x384xf32>, vector<8x384xf32>, vector<8x384xf32>, vector<8x384xf32>, vector<8x384xf32>, vector<8x384xf32>, vector<8x384xf32>, vector<8x384xf32>, vector<8x384xf32> -> vector<72x384xf32>
    %55 = arith.truncf %54 : vector<72x384xf32> to vector<72x384xbf16>
    %c0_43 = arith.constant 0 : index
    %c0_44 = arith.constant 0 : index
    %56 = vector.load %arg8[%c0_43, %c0_44] : memref<8x72xbf16, #tpu.memory_space<vmem>>, vector<8x72xbf16>
    %cst_45 = arith.constant dense<0.000000e+00> : vector<8x384xf32>
    %57 = tpu.matmul %56, %55, %cst_45 {dimension_numbers = #tpu.dot_dimension_numbers<[1], [0], [0], [1], [0, 0, 1, 1], [], []>} : vector<8x72xbf16>, vector<72x384xbf16>, vector<8x384xf32> -> vector<8x384xf32>
    %58 = vector.broadcast %43 : vector<8x1xf32> to vector<8x384xf32>
    %59 = arith.mulf %57, %58 : vector<8x384xf32>
    %60 = vector.broadcast %44 : vector<8x1xf32> to vector<8x384xf32>
    %61 = arith.addf %59, %60 : vector<8x384xf32>
    %cst_46 = arith.constant 0.000000e+00 : f32
    %62 = vector.broadcast %cst_46 : f32 to vector<8x384xf32>
    %63 = arith.maximumf %61, %62 : vector<8x384xf32>
    %64 = vector.broadcast %0 : vector<1x384xf32> to vector<8x384xf32>
    %65 = arith.mulf %63, %64 : vector<8x384xf32>
    %c0_47 = arith.constant 0 : index
    %c0_48 = arith.constant 0 : index
    %c0_49 = arith.constant 0 : index
    %66 = vector.load %arg17[%c0_47, %c0_48, %c0_49] : memref<1x8x384xf32, #tpu.memory_space<vmem>>, vector<1x8x384xf32>
    %67 = vector.shape_cast %66 : vector<1x8x384xf32> to vector<8x384xf32>
    %68 = vector.shape_cast %65 : vector<8x384xf32> to vector<1x8x384xf32>
    tpu.vector_store %arg17[%c0_47, %c0_48, %c0_49], %68 {strides = array<i32>} : memref<1x8x384xf32, #tpu.memory_space<vmem>>, vector<1x8x384xf32>,
    %c0_50 = arith.constant 0 : index
    %c0_51 = arith.constant 0 : index
    %69 = vector.load %arg19[%c0_50, %c0_51] : memref<16x384xf32, #tpu.memory_space<vmem>>, vector<8x384xf32>
    tpu.vector_store %arg19[%c0_50, %c0_51], %65 {strides = array<i32>} : memref<16x384xf32, #tpu.memory_space<vmem>>, vector<8x384xf32>,
    %c0_52 = arith.constant 0 : index
    %c0_53 = arith.constant 0 : index
    %70 = vector.load %arg12[%c0_52, %c0_53] : memref<16x1xf32, #tpu.memory_space<vmem>>, vector<16x1xf32>
    %c0_54 = arith.constant 0 : index
    %c0_55 = arith.constant 0 : index
    %71 = vector.load %arg13[%c0_54, %c0_55] : memref<16x1xf32, #tpu.memory_space<vmem>>, vector<16x1xf32>
    %c0_56 = arith.constant 0 : index
    %c0_57 = arith.constant 0 : index
    %72 = vector.load %arg19[%c0_56, %c0_57] : memref<16x384xf32, #tpu.memory_space<vmem>>, vector<8x384xf32>
    %c19_i32_58 = arith.constant 19 : i32
    %73 = tpu.dynamic_rotate %72 by %c19_i32_58 dim 1 : vector<8x384xf32>, i32 -> vector<8x384xf32>
    %c18_i32_59 = arith.constant 18 : i32
    %74 = tpu.dynamic_rotate %72 by %c18_i32_59 dim 1 : vector<8x384xf32>, i32 -> vector<8x384xf32>
    %c17_i32_60 = arith.constant 17 : i32
    %75 = tpu.dynamic_rotate %72 by %c17_i32_60 dim 1 : vector<8x384xf32>, i32 -> vector<8x384xf32>
    %c1_i32_61 = arith.constant 1 : i32
    %76 = tpu.dynamic_rotate %72 by %c1_i32_61 dim 1 : vector<8x384xf32>, i32 -> vector<8x384xf32>
    %c383_i32_62 = arith.constant 383 : i32
    %77 = tpu.dynamic_rotate %72 by %c383_i32_62 dim 1 : vector<8x384xf32>, i32 -> vector<8x384xf32>
    %c367_i32_63 = arith.constant 367 : i32
    %78 = tpu.dynamic_rotate %72 by %c367_i32_63 dim 1 : vector<8x384xf32>, i32 -> vector<8x384xf32>
    %c366_i32_64 = arith.constant 366 : i32
    %79 = tpu.dynamic_rotate %72 by %c366_i32_64 dim 1 : vector<8x384xf32>, i32 -> vector<8x384xf32>
    %c365_i32_65 = arith.constant 365 : i32
    %80 = tpu.dynamic_rotate %72 by %c365_i32_65 dim 1 : vector<8x384xf32>, i32 -> vector<8x384xf32>
    %81 = tpu.concatenate %73, %74, %75, %76, %72, %77, %78, %79, %80 in 0 : vector<8x384xf32>, vector<8x384xf32>, vector<8x384xf32>, vector<8x384xf32>, vector<8x384xf32>, vector<8x384xf32>, vector<8x384xf32>, vector<8x384xf32>, vector<8x384xf32> -> vector<72x384xf32>
    %82 = arith.truncf %81 : vector<72x384xf32> to vector<72x384xbf16>
    %c0_66 = arith.constant 0 : index
    %c0_67 = arith.constant 0 : index
    %83 = vector.load %arg11[%c0_66, %c0_67] : memref<16x72xbf16, #tpu.memory_space<vmem>>, vector<16x72xbf16>
    %cst_68 = arith.constant dense<0.000000e+00> : vector<16x384xf32>
    %84 = tpu.matmul %83, %82, %cst_68 {dimension_numbers = #tpu.dot_dimension_numbers<[1], [0], [0], [1], [0, 0, 1, 1], [], []>} : vector<16x72xbf16>, vector<72x384xbf16>, vector<16x384xf32> -> vector<16x384xf32>
    %85 = vector.broadcast %70 : vector<16x1xf32> to vector<16x384xf32>
    %86 = arith.mulf %84, %85 : vector<16x384xf32>
    %87 = vector.broadcast %71 : vector<16x1xf32> to vector<16x384xf32>
    %88 = arith.addf %86, %87 : vector<16x384xf32>
    %cst_69 = arith.constant 0.000000e+00 : f32
    %89 = vector.broadcast %cst_69 : f32 to vector<16x384xf32>
    %90 = arith.maximumf %88, %89 : vector<16x384xf32>
    %91 = vector.broadcast %0 : vector<1x384xf32> to vector<16x384xf32>
    %92 = arith.mulf %90, %91 : vector<16x384xf32>
    %c0_70 = arith.constant 0 : index
    %c0_71 = arith.constant 0 : index
    %93 = vector.load %arg19[%c0_70, %c0_71] : memref<16x384xf32, #tpu.memory_space<vmem>>, vector<16x384xf32>
    tpu.vector_store %arg19[%c0_70, %c0_71], %92 {strides = array<i32>} : memref<16x384xf32, #tpu.memory_space<vmem>>, vector<16x384xf32>,
    %c0_72 = arith.constant 0 : index
    %c0_73 = arith.constant 0 : index
    %94 = vector.load %arg15[%c0_72, %c0_73] : memref<8x1xf32, #tpu.memory_space<vmem>>, vector<8x1xf32>
    %c0_74 = arith.constant 0 : index
    %c0_75 = arith.constant 0 : index
    %95 = vector.load %arg19[%c0_74, %c0_75] : memref<16x384xf32, #tpu.memory_space<vmem>>, vector<16x384xf32>
    %c19_i32_76 = arith.constant 19 : i32
    %96 = tpu.dynamic_rotate %95 by %c19_i32_76 dim 1 : vector<16x384xf32>, i32 -> vector<16x384xf32>
    %c18_i32_77 = arith.constant 18 : i32
    %97 = tpu.dynamic_rotate %95 by %c18_i32_77 dim 1 : vector<16x384xf32>, i32 -> vector<16x384xf32>
    %c17_i32_78 = arith.constant 17 : i32
    %98 = tpu.dynamic_rotate %95 by %c17_i32_78 dim 1 : vector<16x384xf32>, i32 -> vector<16x384xf32>
    %c1_i32_79 = arith.constant 1 : i32
    %99 = tpu.dynamic_rotate %95 by %c1_i32_79 dim 1 : vector<16x384xf32>, i32 -> vector<16x384xf32>
    %c383_i32_80 = arith.constant 383 : i32
    %100 = tpu.dynamic_rotate %95 by %c383_i32_80 dim 1 : vector<16x384xf32>, i32 -> vector<16x384xf32>
    %c367_i32_81 = arith.constant 367 : i32
    %101 = tpu.dynamic_rotate %95 by %c367_i32_81 dim 1 : vector<16x384xf32>, i32 -> vector<16x384xf32>
    %c366_i32_82 = arith.constant 366 : i32
    %102 = tpu.dynamic_rotate %95 by %c366_i32_82 dim 1 : vector<16x384xf32>, i32 -> vector<16x384xf32>
    %c365_i32_83 = arith.constant 365 : i32
    %103 = tpu.dynamic_rotate %95 by %c365_i32_83 dim 1 : vector<16x384xf32>, i32 -> vector<16x384xf32>
    %104 = tpu.concatenate %96, %97, %98, %99, %95, %100, %101, %102, %103 in 0 : vector<16x384xf32>, vector<16x384xf32>, vector<16x384xf32>, vector<16x384xf32>, vector<16x384xf32>, vector<16x384xf32>, vector<16x384xf32>, vector<16x384xf32>, vector<16x384xf32> -> vector<144x384xf32>
    %105 = arith.truncf %104 : vector<144x384xf32> to vector<144x384xbf16>
    %c0_84 = arith.constant 0 : index
    %c0_85 = arith.constant 0 : index
    %106 = vector.load %arg14[%c0_84, %c0_85] : memref<8x144xbf16, #tpu.memory_space<vmem>>, vector<8x144xbf16>
    %cst_86 = arith.constant dense<0.000000e+00> : vector<8x384xf32>
    %107 = tpu.matmul %106, %105, %cst_86 {dimension_numbers = #tpu.dot_dimension_numbers<[1], [0], [0], [1], [0, 0, 1, 1], [], []>} : vector<8x144xbf16>, vector<144x384xbf16>, vector<8x384xf32> -> vector<8x384xf32>
    %cst_87 = arith.constant 1.000000e+00 : f32
    %108 = vector.broadcast %cst_87 : f32 to vector<8x384xf32>
    %109 = arith.mulf %107, %108 : vector<8x384xf32>
    %110 = vector.broadcast %94 : vector<8x1xf32> to vector<8x384xf32>
    %111 = arith.addf %109, %110 : vector<8x384xf32>
    %112 = arith.negf %111 : vector<8x384xf32>
    %113 = math.exp %112 : vector<8x384xf32>
    %cst_88 = arith.constant 1.000000e+00 : f32
    %114 = vector.broadcast %cst_88 : f32 to vector<8x384xf32>
    %115 = arith.addf %114, %113 : vector<8x384xf32>
    %116 = arith.divf %114, %115 : vector<8x384xf32>
    %c0_89 = arith.constant 0 : index
    %c0_90 = arith.constant 0 : index
    %c0_91 = arith.constant 0 : index
    %117 = vector.load %arg18[%c0_89, %c0_90, %c0_91] : memref<1x8x384xf32, #tpu.memory_space<vmem>>, vector<1x8x384xf32>
    %118 = vector.shape_cast %117 : vector<1x8x384xf32> to vector<8x384xf32>
    %119 = vector.shape_cast %116 : vector<8x384xf32> to vector<1x8x384xf32>
    tpu.vector_store %arg18[%c0_89, %c0_90, %c0_91], %119 {strides = array<i32>} : memref<1x8x384xf32, #tpu.memory_space<vmem>>, vector<1x8x384xf32>,
    return
  }
  func.func @transform_0(%arg0: i32) -> (i32, i32, i32) {
    %c0_i32 = arith.constant 0 : i32
    %c0_i32_0 = arith.constant 0 : i32
    %c0_i32_1 = arith.constant 0 : i32
    return %arg0, %c0_i32, %c0_i32_0 : i32, i32, i32
  }
  func.func @transform_1(%arg0: i32) -> (i32, i32, i32) {
    %c0_i32 = arith.constant 0 : i32
    %c0_i32_0 = arith.constant 0 : i32
    %c0_i32_1 = arith.constant 0 : i32
    return %arg0, %c0_i32, %c0_i32_0 : i32, i32, i32
  }
  func.func @transform_2(%arg0: i32) -> (i32, i32) {
    %c0_i32 = arith.constant 0 : i32
    %c0_i32_0 = arith.constant 0 : i32
    %c0_i32_1 = arith.constant 0 : i32
    return %c0_i32, %c0_i32_0 : i32, i32
  }
  func.func @transform_3(%arg0: i32) -> (i32, i32) {
    %c0_i32 = arith.constant 0 : i32
    %c0_i32_0 = arith.constant 0 : i32
    %c0_i32_1 = arith.constant 0 : i32
    return %c0_i32, %c0_i32_0 : i32, i32
  }
  func.func @transform_4(%arg0: i32) -> (i32, i32) {
    %c0_i32 = arith.constant 0 : i32
    %c0_i32_0 = arith.constant 0 : i32
    %c0_i32_1 = arith.constant 0 : i32
    return %c0_i32, %c0_i32_0 : i32, i32
  }
  func.func @transform_5(%arg0: i32) -> (i32, i32) {
    %c0_i32 = arith.constant 0 : i32
    %c0_i32_0 = arith.constant 0 : i32
    %c0_i32_1 = arith.constant 0 : i32
    return %c0_i32, %c0_i32_0 : i32, i32
  }
  func.func @transform_6(%arg0: i32) -> (i32, i32) {
    %c0_i32 = arith.constant 0 : i32
    %c0_i32_0 = arith.constant 0 : i32
    %c0_i32_1 = arith.constant 0 : i32
    return %c0_i32, %c0_i32_0 : i32, i32
  }
  func.func @transform_7(%arg0: i32) -> (i32, i32) {
    %c0_i32 = arith.constant 0 : i32
    %c0_i32_0 = arith.constant 0 : i32
    %c0_i32_1 = arith.constant 0 : i32
    return %c0_i32, %c0_i32_0 : i32, i32
  }
  func.func @transform_8(%arg0: i32) -> (i32, i32) {
    %c0_i32 = arith.constant 0 : i32
    %c0_i32_0 = arith.constant 0 : i32
    %c0_i32_1 = arith.constant 0 : i32
    return %c0_i32, %c0_i32_0 : i32, i32
  }
  func.func @transform_9(%arg0: i32) -> (i32, i32) {
    %c0_i32 = arith.constant 0 : i32
    %c0_i32_0 = arith.constant 0 : i32
    %c0_i32_1 = arith.constant 0 : i32
    return %c0_i32, %c0_i32_0 : i32, i32
  }
  func.func @transform_10(%arg0: i32) -> (i32, i32) {
    %c0_i32 = arith.constant 0 : i32
    %c0_i32_0 = arith.constant 0 : i32
    %c0_i32_1 = arith.constant 0 : i32
    return %c0_i32, %c0_i32_0 : i32, i32
  }
  func.func @transform_11(%arg0: i32) -> (i32, i32) {
    %c0_i32 = arith.constant 0 : i32
    %c0_i32_0 = arith.constant 0 : i32
    %c0_i32_1 = arith.constant 0 : i32
    return %c0_i32, %c0_i32_0 : i32, i32
  }
  func.func @transform_12(%arg0: i32) -> (i32, i32) {
    %c0_i32 = arith.constant 0 : i32
    %c0_i32_0 = arith.constant 0 : i32
    %c0_i32_1 = arith.constant 0 : i32
    return %c0_i32, %c0_i32_0 : i32, i32
  }
  func.func @transform_13(%arg0: i32) -> (i32, i32) {
    %c0_i32 = arith.constant 0 : i32
    %c0_i32_0 = arith.constant 0 : i32
    %c0_i32_1 = arith.constant 0 : i32
    return %c0_i32, %c0_i32_0 : i32, i32
  }
  func.func @transform_14(%arg0: i32) -> (i32, i32) {
    %c0_i32 = arith.constant 0 : i32
    %c0_i32_0 = arith.constant 0 : i32
    %c0_i32_1 = arith.constant 0 : i32
    return %c0_i32, %c0_i32_0 : i32, i32
  }
  func.func @transform_15(%arg0: i32) -> (i32, i32) {
    %c0_i32 = arith.constant 0 : i32
    %c0_i32_0 = arith.constant 0 : i32
    %c0_i32_1 = arith.constant 0 : i32
    return %c0_i32, %c0_i32_0 : i32, i32
  }
  func.func @transform_16(%arg0: i32) -> (i32, i32, i32) {
    %c0_i32 = arith.constant 0 : i32
    %c0_i32_0 = arith.constant 0 : i32
    %c0_i32_1 = arith.constant 0 : i32
    return %arg0, %c0_i32, %c0_i32_0 : i32, i32, i32
  }
  func.func @transform_17(%arg0: i32) -> (i32, i32, i32) {
    %c0_i32 = arith.constant 0 : i32
    %c0_i32_0 = arith.constant 0 : i32
    %c0_i32_1 = arith.constant 0 : i32
    return %arg0, %c0_i32, %c0_i32_0 : i32, i32, i32
  }
}

</mosaic_0001>

<bundles_post_ra>
// kernel: decoder_block_forward.1
= control target key start
LH: loop header
LB: loop body
LE: loop exit
PB: predicated region body
PF: predicated region fallthrough
CT: control target
= control target key end

     0   :  { %s2311_s24 = smov 0   ;;  %s3106_s0 = inlined_call_operand.vmem [shape: f32[2,8,384], index: 0, kind: input, shape index: {}]   ;;  %s3107_s1 = inlined_call_operand.vmem [shape: f32[2,8,384], index: 1, kind: input, shape index: {}]   ;;  %s3108_s2 = inlined_call_operand.vmem [shape: bf16[8,32], index: 2, kind: input, shape index: {}]   ;;  %s3109_s3 = inlined_call_operand.vmem [shape: f32[8,1], index: 3, kind: input, shape index: {}]   ;;  %s3110_s4 = inlined_call_operand.vmem [shape: bf16[8,144], index: 4, kind: input, shape index: {}]   ;;  %s3111_s5 = inlined_call_operand.vmem [shape: f32[8,1], index: 5, kind: input, shape index: {}]   ;;  %s3112_s6 = inlined_call_operand.vmem [shape: f32[8,1], index: 6, kind: input, shape index: {}]   ;;  %s3113_s7 = inlined_call_operand.vmem [shape: bf16[8,72], index: 7, kind: input, shape index: {}]   ;;  %s3114_s8 = inlined_call_operand.vmem [shape: f32[8,1], index: 8, kind: input, shape index: {}]   ;;  %s3115_s9 = inlined_call_operand.vmem [shape: f32[8,1], index: 9, kind: input, shape index: {}]   ;;  %s3116_s10 = inlined_call_operand.vmem [shape: bf16[16,72], index: 10, kind: input, shape index: {}]   ;;  %s3117_s11 = inlined_call_operand.vmem [shape: f32[16,1], index: 11, kind: input, shape index: {}]   ;;  %s3118_s12 = inlined_call_operand.vmem [shape: f32[16,1], index: 12, kind: input, shape index: {}]   ;;  %s3119_s13 = inlined_call_operand.vmem [shape: bf16[8,144], index: 13, kind: input, shape index: {}]   ;;  %s3120_s14 = inlined_call_operand.vmem [shape: f32[8,1], index: 14, kind: input, shape index: {}]   ;;  %s3121_s15 = inlined_call_operand.vmem [shape: f32[1,384], index: 15, kind: input, shape index: {}]   ;;  %s3122_s16 = inlined_call_operand.vmem [shape: f32[2,8,384], index: 16, kind: output, shape index: {0}]   ;;  %s3123_s17 = inlined_call_operand.vmem [shape: f32[2,8,384], index: 17, kind: output, shape index: {1}]  }
   0x1   :  { %3126 = sst [smem:[#allocation3_spill]] %s3106_s0 }
   0x2   :  { %3127 = sst [smem:[#allocation4_spill]] %s3107_s1 }
   0x3 LB: > { %s1802_s25 = sadd.s32 4294967295, %s2210_s24   ;;  %p1806_p0 = scmp.ge.s32.totalorder %s2210_s24, 1  ;;  %s2210_s24 = sphi %s2311_s24, %s28_s24  }
   0x4   : > { %p500_p1 = scmp.lt.s32.totalorder %s2210_s24, 3 }
   0x6   : > { %p501_p2 = pnand %p1806_p0, %p500_p1 }
   0x7   : > { %p562_p3 = scmp.lt.s32.totalorder (!%p501_p2), %s1802_s25, 1  ;;  %s3128_s29 = sld [smem:[#allocation3_spill]] (!%p501_p2) }
   0x8   : > { %504 = sbr.rel (%p501_p2) target bundleno = 1559 (0x617), region = 84  ;;  %s2212_s30 = smov (!%p501_p2), 19  }
   0x9   : > { %s2213_s18 = smov (!%p501_p2), 18   ;;  %s2214_s19 = smov (!%p501_p2), 1  }
   0xa   : > { %s2216_s1 = smov (!%p501_p2), 110   ;;  %s2217_s20 = smov (!%p501_p2), 17  }
   0xb   : > { %s2218_s21 = smov (!%p501_p2), 111   ;;  %s2219_s22 = smov (!%p501_p2), 127  }
   0xc   : > { %s3124_s23 = smov (!%p501_p2), 109  }
   0xd   : > { %s3132_s25 = smov (!%p562_p3, %s1802_s25), 1  ;;  %v626_v4 = vld [vmem:[%s3109_s3] sm:$0xff]  ;;  %v2215_v5 = vmov 0   ;;  %v593_v6 = vlaneseq  ;;  %vm632_vm3 = vcmask 261120   ;;  %vm885_vm8 = vcmask 130048  }
   0xe   : > { %s2319_s26 = smul.u32 24, %s3132_s25  ;;  %1869 = vset.pattern.permute.xlu0 %v2215_v5  ;;  %1990 = vset.pattern.permute.xlu2 %v2215_v5  ;;  %v625_v31 = vld [vmem:[%s3108_s2] sm:$0xf]  ;;  %vm1089_vm10 = vcmask 1043456   ;;  %vm1085_vm11 = vcmask 588800  }
   0xf   : > { %2071 = vset.pattern.permute.xlu1 %v2215_v5  ;;  %v2334_v7 = vand.u32 127, %v593_v6  ;;  %v583_v36 = vld [vmem:[%s3121_s15] sm:$0x7] }
  0x10   : > { %s566_s0 = scalar_lea.vmem %s3128_s29, %s2319_s26  ;;  %s3129_s29 = sld [smem:[#allocation4_spill]]  ;;  %v2367_v38 = vperm.slane %v583_v36, 1  ;;  %v2374_v43 = vperm.slane %v583_v36, 0  ;;  %v2386_v51 = vperm.slane %v583_v36, 2  ;;  %v695_v62 = vld [vmem:[%s3112_s6] sm:$0xff] }
  0x11   : > { %v584_v0 = vld [vmem:[%s566_s0] sm:$0xff]  ;;  %v585_v1 = vld [vmem:[%s566_s0 + $0x8] sm:$0xff]  ;;  %v586_v3 = vld [vmem:[%s566_s0 + $0x10] sm:$0xff]  ;;  %vm595_vm0 = vcmp.lt.s32.totalorder %v2334_v7, 1  ;;  %vm605_vm1 = vcmp.lt.s32.totalorder %v2334_v7, 18  ;;  %vm615_vm2 = vcmp.lt.s32.totalorder %v2334_v7, 19 }
  0x12   : > { %v1859_v2 = vpack.i.bf16 %v585_v1, %v584_v0  ;;  %vm825_vm4 = vcmp.lt.s32.totalorder %v2334_v7, 110  ;;  %vm806_vm5 = vcmp.lt.s32.totalorder %v2334_v7, 111  ;;  %vm787_vm6 = vcmp.lt.s32.totalorder %v2334_v7, 127 }
  0x13   : > { %vm844_vm7 = vcmp.lt.s32.totalorder %v2334_v7, 109  ;;  %vm750_vm9 = vcmp.lt.s32.totalorder %v2334_v7, 17 }
  0x14   : > { %1860 = vrot.lane.b32.xlu1 %v1859_v2, %s2212_s30  ;;  %1855 = vrot.lane.b32.xlu0 %v1859_v2, %s2213_s18 }
  0x15   : > { %1865 = vrot.lane.b32.xlu2 %v1859_v2, %s2214_s19 }
  0x16   : > { %s571_s0 = scalar_lea.vmem %s3129_s29, %s2319_s26  ;;  %s3098_s29 = scalar_lea.vmem %s3123_s17, %s2319_s26 }
  0x17   : > { %v2369_v41 = vld [vmem:[%s571_s0 + $0x8] sm:$0xff]  ;;  %v2381_v48 = vld [vmem:[%s571_s0] sm:$0xff]  ;;  %v2398_v58 = vld [vmem:[%s571_s0 + $0x10] sm:$0xff]  ;;  %s576_s0 = scalar_lea.vmem %s3122_s16, %s2319_s26 }
  0x1c   : > { %613 = vrot.lane.b32.xlu1 %v586_v3, %s2212_s30  ;;  %603 = vrot.lane.b32.xlu0 %v586_v3, %s2213_s18 }
  0x1d   : > { %591 = vrot.lane.b32.xlu2 %v586_v3, %s2214_s19 }
  0x24   : > { %629 = vperm.xlu0 %1869, %v626_v4  }
  0x6f   : > { %v1866_v8 = vpop.permute.xlu2 %1865 }
  0x70   : > { %v1868_v9 = vunpack.i.h.bf16 %v1866_v8  ;;  %v1867_v10 = vunpack.i.l.bf16 %v1866_v8 }
  0x72   : > { %v597_v19 = vsel %vm595_vm0, %v1867_v10, %v1868_v9 }
  0x73   : > { %v620_v21 = vpack.c.bf16 %v597_v19, %v585_v1 }
  0x77   : > { %v592_v22 = vpop.permute.xlu2 %591 }
  0x78   : > { %v596_v32 = vsel %vm595_vm0, %v1868_v9, %v592_v22  ;;  %v598_v33 = vsel %vm595_vm0, %v592_v22, %v1867_v10 }
  0x79   : > { %v619_v34 = vpack.c.bf16 %v598_v33, %v584_v0  ;;  %v621_v35 = vpack.c.bf16 %v596_v32, %v586_v3 }
  0x86   : > { %v1861_v11 = vpop.permute.xlu1 %1860  ;;  %v1856_v12 = vpop.permute.xlu0 %1855 }
  0x87   : > { %v1863_v13 = vunpack.i.h.bf16 %v1861_v11  ;;  %v1862_v14 = vunpack.i.l.bf16 %v1861_v11  ;;  %v1858_v15 = vunpack.i.h.bf16 %v1856_v12  ;;  %v1857_v16 = vunpack.i.l.bf16 %v1856_v12 }
  0x89   : > { %v607_v17 = vsel %vm605_vm1, %v1857_v16, %v1858_v15  ;;  %v617_v18 = vsel %vm615_vm2, %v1862_v14, %v1863_v13 }
  0x8a   : > { %v623_v20 = vpack.c.bf16 %v617_v18, %v607_v17 }
  0x8c   : > { %655 = vmatpush.bf16.msra.mxu1 %v623_v20 }
  0x8e   : > { %v614_v23 = vpop.permute.xlu1 %613  ;;  %v604_v24 = vpop.permute.xlu0 %603 }
  0x8f   : > { %v608_v25 = vsel %vm605_vm1, %v604_v24, %v1857_v16  ;;  %v618_v26 = vsel %vm615_vm2, %v614_v23, %v1862_v14  ;;  %v606_v27 = vsel %vm605_vm1, %v1858_v15, %v604_v24  ;;  %v616_v28 = vsel %vm615_vm2, %v1863_v13, %v614_v23 }
  0x90   : > { %656 = vmatpush.bf16.msra.mxu1 %v620_v21  ;;  %v622_v29 = vpack.c.bf16 %v618_v26, %v608_v25  ;;  %v624_v30 = vpack.c.bf16 %v616_v28, %v606_v27 }
  0x92   : > { %642 = vmatpush.bf16.msra.mxu0 %v622_v29  ;;  %668 = vmatpush.bf16.msra.mxu2 %v624_v30 }
  0x93   : > { %1812 = vmatmul.msk.bf16.vlgmr.msra.gmra.mxu1 %vm632_vm3, %v625_v31 }
  0x96   : > { %643 = vmatpush.bf16.msra.mxu0 %v619_v34  ;;  %669 = vmatpush.bf16.msra.mxu2 %v621_v35  ;;  %v630_v37 = vpop.permute.xlu0 %629 }
  0x99   : > { %1811 = vmatmul.msk.bf16.vlgmr.msra.gmra.mxu0 %vm632_vm3, %v625_v31  ;;  %1813 = vmatmul.msk.bf16.vlgmr.msra.gmra.mxu2 %vm632_vm3, %v625_v31 }
 0x110   : > { %v658_v39 = vpop.f32.mrf.mxu1 }
 0x111   : > { %v659_v40 = vadd.f32 %v658_v39, %v630_v37 }
 0x113   : > { %v2372_v42 = vmul.f32 %v2367_v38, %v659_v40 }
 0x115   : > { %v1875_v44 = vpack.i.bf16 %v2369_v41, %v2372_v42  ;;  %v864_v47 = vpack.c.bf16 %v2369_v41, %v2372_v42 }
 0x116   : > { %v645_v45 = vpop.f32.mrf.mxu0 }
 0x117   : > { %v646_v46 = vadd.f32 %v645_v45, %v630_v37  ;;  %1876 = vrot.lane.b32.xlu2 %v1875_v44, %s2216_s1 }
 0x118   : > { %v660_v49 = vpop.f32.mrf.mxu1 }
 0x119   : > { %v2384_v50 = vmul.f32 %v2374_v43, %v646_v46  ;;  %v2481_v49 = vld [vmem:[%s3110_s4] sm:$0xff] }
 0x11b   : > { %v1910_v52 = vpack.i.bf16 %v2381_v48, %v2384_v50  ;;  %v863_v55 = vpack.c.bf16 %v2381_v48, %v2384_v50 }
 0x11c   : > { %v671_v53 = vpop.f32.mrf.mxu2 }
 0x11d   : > { %v672_v54 = vadd.f32 %v671_v53, %v630_v37  ;;  %1911 = vrot.lane.b32.xlu0 %v1910_v52, %s2217_s20  ;;  %1871 = vrot.lane.b32.xlu1 %v1910_v52, %s2216_s1 }
 0x11e   : > { %v647_v56 = vpop.f32.mrf.mxu0 }
 0x11f   : > { %v2395_v57 = vmul.f32 %v2386_v51, %v672_v54  ;;  %1886 = vrot.lane.b32.xlu2 %v1875_v44, %s2218_s21 }
 0x121   : > { %v865_v59 = vpack.c.bf16 %v2398_v58, %v2395_v57  ;;  %v1925_v61 = vpack.i.bf16 %v2398_v58, %v2395_v57 }
 0x124   : > { %v673_v60 = vpop.f32.mrf.mxu2 }
 0x125   : > { %1921 = vrot.lane.b32.xlu0 %v1910_v52, %s2213_s18  ;;  %1881 = vrot.lane.b32.xlu1 %v1910_v52, %s2218_s21 }
 0x127   : > { %1896 = vrot.lane.b32.xlu2 %v1875_v44, %s2219_s22 }
 0x12d   : > { %1926 = vrot.lane.b32.xlu0 %v1925_v61, %s2216_s1  ;;  %1891 = vrot.lane.b32.xlu1 %v1910_v52, %s2219_s22 }
 0x12f   : > { %1901 = vrot.lane.b32.xlu2 %v1910_v52, %s2214_s19 }
 0x135   : > { %1931 = vrot.lane.b32.xlu0 %v1925_v61, %s2218_s21  ;;  %1906 = vrot.lane.b32.xlu1 %v1875_v44, %s3124_s23 }
 0x137   : > { %1916 = vrot.lane.b32.xlu2 %v1875_v44, %s2214_s19 }
 0x13d   : > { %1941 = vrot.lane.b32.xlu0 %v1925_v61, %s2214_s19  ;;  %1936 = vrot.lane.b32.xlu1 %v1925_v61, %s2219_s22 }
 0x13f   : > { %1946 = vrot.lane.b32.xlu2 %v1925_v61, %s3124_s23 }
 0x145   : > { %1956 = vrot.lane.b32.xlu0 %v1875_v44, %s2217_s20  ;;  %1961 = vrot.lane.b32.xlu1 %v1925_v61, %s2217_s20 }
 0x147   : > { %1951 = vrot.lane.b32.xlu2 %v1910_v52, %s3124_s23 }
 0x14d   : > { %1981 = vrot.lane.b32.xlu0 %v1875_v44, %s2213_s18  ;;  %1966 = vrot.lane.b32.xlu1 %v1925_v61, %s2213_s18 }
 0x14f   : > { %1976 = vrot.lane.b32.xlu2 %v1925_v61, %s2212_s30 }
 0x155   : > { %977 = vperm.xlu0 %1869, %v695_v62   ;;  %1971 = vrot.lane.b32.xlu1 %v1910_v52, %s2212_s30 }
 0x15d   : > { %1986 = vrot.lane.b32.xlu1 %v1875_v44, %s2212_s30 }
 0x171   : > { %v1877_v63 = vpop.permute.xlu2 %1876 }
 0x172   : > { %v1879_v5 = vunpack.i.h.bf16 %v1877_v63  ;;  %v1878_v6 = vunpack.i.l.bf16 %v1877_v63 }
 0x179   : > { %v2427_v0 = vpop.permute.xlu2 %1886 }
 0x17a   : > { %v1889_v16 = vunpack.i.h.bf16 %v2427_v0  ;;  %v1888_v17 = vunpack.i.l.bf16 %v2427_v0 }
 0x181   : > { %v2429_v1 = vpop.permute.xlu2 %1896 }
 0x182   : > { %v1899_v30 = vunpack.i.h.bf16 %v2429_v1  ;;  %v1898_v31 = vunpack.i.l.bf16 %v2429_v1 }
 0x189   : > { %v2431_v2 = vpop.permute.xlu2 %1901 }
 0x18f   : > { %v2433_v3 = vpop.permute.xlu0 %1911  ;;  %v1872_v4 = vpop.permute.xlu1 %1871 }
 0x190   : > { %v1874_v8 = vunpack.i.h.bf16 %v1872_v4  ;;  %v1873_v9 = vunpack.i.l.bf16 %v1872_v4  ;;  %v881_v4 = vunpack.c.h.b16 %v2481_v49  ;;  %v1914_v1 = vunpack.i.h.bf16 %v2433_v3 }
 0x191   : > { %v2436_v10 = vpop.permute.xlu2 %1916 }
 0x192   : > { %v828_v11 = vsel %vm825_vm4, %v1873_v9, %v1878_v6  ;;  %v829_v12 = vsel %vm825_vm4, %v1874_v8, %v1879_v5 }
 0x193   : > { %v872_v13 = vpack.c.bf16 %v829_v12, %v828_v11 }
 0x195   : > { %889 = vmatpush.bf16.msra.mxu3 %v872_v13 }
 0x197   : > { %v2442_v14 = vpop.permute.xlu0 %1921  ;;  %v1882_v15 = vpop.permute.xlu1 %1881 }
 0x198   : > { %v1884_v18 = vunpack.i.h.bf16 %v1882_v15  ;;  %v1883_v19 = vunpack.i.l.bf16 %v1882_v15  ;;  %v1924_v57 = vunpack.i.h.bf16 %v2442_v14  ;;  %v1923_v58 = vunpack.i.l.bf16 %v2442_v14 }
 0x199   : > { %v1947_v20 = vpop.permute.xlu2 %1946 }
 0x19a   : > { %v809_v21 = vsel %vm806_vm5, %v1883_v19, %v1888_v17  ;;  %v810_v22 = vsel %vm806_vm5, %v1884_v18, %v1889_v16  ;;  %v1949_v52 = vunpack.i.h.bf16 %v1947_v20  ;;  %v1948_v53 = vunpack.i.l.bf16 %v1947_v20 }
 0x19b   : > { %v869_v23 = vpack.c.bf16 %v810_v22, %v809_v21 }
 0x19d   : > { %890 = vmatpush.bf16.msra.mxu3 %v869_v23  ;;  %v1903_v23 = vunpack.i.l.bf16 %v2431_v2 }
 0x19f   : > { %v1927_v24 = vpop.permute.xlu0 %1926  ;;  %v2451_v25 = vpop.permute.xlu1 %1891 }
 0x1a0   : > { %v1929_v26 = vunpack.i.h.bf16 %v1927_v24  ;;  %v1928_v27 = vunpack.i.l.bf16 %v1927_v24  ;;  %v1894_v28 = vunpack.i.h.bf16 %v2451_v25  ;;  %v1893_v29 = vunpack.i.l.bf16 %v2451_v25 }
 0x1a1   : > { %v1952_v32 = vpop.permute.xlu2 %1951 }
 0x1a2   : > { %v790_v33 = vsel %vm787_vm6, %v1893_v29, %v1898_v31  ;;  %v791_v34 = vsel %vm787_vm6, %v1894_v28, %v1899_v30  ;;  %v826_v35 = vsel %vm825_vm4, %v1878_v6, %v1928_v27  ;;  %v827_v37 = vsel %vm825_vm4, %v1879_v5, %v1929_v26 }
 0x1a3   : > { %v866_v36 = vpack.c.bf16 %v791_v34, %v790_v33  ;;  %v873_v39 = vpack.c.bf16 %v827_v37, %v826_v35  ;;  %v830_v40 = vsel %vm825_vm4, %v1928_v27, %v1873_v9  ;;  %v831_v44 = vsel %vm825_vm4, %v1929_v26, %v1874_v8 }
 0x1a4   : > { %v1954_v45 = vunpack.i.h.bf16 %v1952_v32  ;;  %v1953_v46 = vunpack.i.l.bf16 %v1952_v32  ;;  %v874_v0 = vpack.c.bf16 %v831_v44, %v830_v40  ;;  %v1919_v34 = vunpack.i.h.bf16 %v2436_v10 }
 0x1a5   : > { %891 = vmatpush.bf16.msra.mxu3 %v866_v36  ;;  %915 = vmatpush.bf16.msrb.mxu1 %v873_v39  ;;  %v1918_v35 = vunpack.i.l.bf16 %v2436_v10 }
 0x1a6   : > { %v849_v5 = vsel %vm844_vm7, %v1948_v53, %v1953_v46  ;;  %v850_v6 = vsel %vm844_vm7, %v1949_v52, %v1954_v45 }
 0x1a7   : > { %v1932_v54 = vpop.permute.xlu0 %1931  ;;  %v1907_v56 = vpop.permute.xlu1 %1906  ;;  %v877_v22 = vpack.c.bf16 %v850_v6, %v849_v5 }
 0x1a8   : > { %v1934_v60 = vunpack.i.h.bf16 %v1932_v54  ;;  %v1933_v61 = vunpack.i.l.bf16 %v1932_v54  ;;  %v1909_v62 = vunpack.i.h.bf16 %v1907_v56  ;;  %v1908_v63 = vunpack.i.l.bf16 %v1907_v56 }
 0x1a9   : > { %892 = vmatpush.bf16.msra.mxu3 %v863_v55 }
 0x1aa   : > { %v847_v8 = vsel %vm844_vm7, %v1953_v46, %v1908_v63  ;;  %v848_v9 = vsel %vm844_vm7, %v1954_v45, %v1909_v62  ;;  %v807_v12 = vsel %vm806_vm5, %v1888_v17, %v1933_v61  ;;  %v808_v13 = vsel %vm806_vm5, %v1889_v16, %v1934_v60 }
 0x1ab   : > { %v875_v11 = vpack.c.bf16 %v848_v9, %v847_v8  ;;  %v845_v15 = vsel %vm844_vm7, %v1908_v63, %v1948_v53  ;;  %v870_v20 = vpack.c.bf16 %v808_v13, %v807_v12  ;;  %v846_v48 = vsel %vm844_vm7, %v1909_v62, %v1949_v52 }
 0x1ac   : > { %v811_v50 = vsel %vm806_vm5, %v1933_v61, %v1883_v19  ;;  %v812_v55 = vsel %vm806_vm5, %v1934_v60, %v1884_v18  ;;  %v876_v21 = vpack.c.bf16 %v846_v48, %v845_v15  ;;  %v2508_v17 = vpack.c.b16 %v881_v4, %v881_v4  ;;  %v694_v61 = vld [vmem:[%s3111_s5] sm:$0xff] }
 0x1ad   : > { %909 = vmatpush.bf16.msrb.mxu0 %v875_v11  ;;  %916 = vmatpush.bf16.msrb.mxu1 %v870_v20  ;;  %v1904_v16 = vunpack.i.h.bf16 %v2431_v2  ;;  %v871_v27 = vpack.c.bf16 %v812_v55, %v811_v50  ;;  %v771_v46 = vsel %vm595_vm0, %v1903_v23, %v1918_v35 }
 0x1ae   : > { %935 = vmatpush.bf16.msrb.mxu2 %v876_v21  ;;  %969 = vperm.xlu2 %1990, %v694_v61  }
 0x1af   : > { %v1942_v24 = vpop.permute.xlu0 %1941  ;;  %v1937_v26 = vpop.permute.xlu1 %1936  ;;  %v772_v25 = vsel %vm595_vm0, %v1904_v16, %v1919_v34 }
 0x1b0   : > { %v1944_v19 = vunpack.i.h.bf16 %v1942_v24  ;;  %v1943_v32 = vunpack.i.l.bf16 %v1942_v24  ;;  %v1939_v18 = vunpack.i.h.bf16 %v1937_v26  ;;  %v1938_v33 = vunpack.i.l.bf16 %v1937_v26  ;;  %1814 = vmatmul.msk.bf16.vlgmr.msrb.gmra.mxu0 %vm885_vm8, %v2508_v17  ;;  %v1977_v24 = vpop.permute.xlu2 %1976 }
 0x1b1   : > { %941 = vmatpush.bf16.msra.mxu0 %v874_v0  ;;  %1815 = vmatmul.msk.bf16.vlgmr.msrb.gmra.mxu2 %vm885_vm8, %v2508_v17  ;;  %v861_v4 = vpack.c.bf16 %v772_v25, %v771_v46 }
 0x1b2   : > { %961 = vmatpush.bf16.msra.mxu2 %v877_v22  ;;  %v773_v2 = vsel %vm595_vm0, %v1943_v32, %v1903_v23  ;;  %v774_v36 = vsel %vm595_vm0, %v1944_v19, %v1904_v16  ;;  %v788_v37 = vsel %vm787_vm6, %v1898_v31, %v1938_v33  ;;  %v789_v39 = vsel %vm787_vm6, %v1899_v30, %v1939_v18 }
 0x1b3   : > { %v860_v40 = vpack.c.bf16 %v774_v36, %v773_v2  ;;  %v867_v44 = vpack.c.bf16 %v789_v39, %v788_v37  ;;  %v792_v10 = vsel %vm787_vm6, %v1938_v33, %v1893_v29  ;;  %v793_v45 = vsel %vm787_vm6, %v1939_v18, %v1894_v28 }
 0x1b4   : > { %v868_v31 = vpack.c.bf16 %v793_v45, %v792_v10  ;;  %v1913_v30 = vunpack.i.l.bf16 %v2433_v3  ;;  %v769_v28 = vsel %vm595_vm0, %v1918_v35, %v1943_v32  ;;  %v770_v53 = vsel %vm595_vm0, %v1919_v34, %v1944_v19 }
 0x1b5   : > { %942 = vmatpush.bf16.msra.mxu0 %v871_v27  ;;  %893 = vmatpush.bf16.msra.mxu3 %v860_v40  ;;  %v862_v5 = vpack.c.bf16 %v770_v53, %v769_v28  ;;  %v1979_v27 = vunpack.i.h.bf16 %v1977_v24  ;;  %v1978_v32 = vunpack.i.l.bf16 %v1977_v24  ;;  %v880_v34 = vunpack.c.l.b16 %v2481_v49 }
 0x1b6   : > { %917 = vmatpush.bf16.msrb.mxu1 %v867_v44 }
 0x1b7   : > { %v1957_v29 = vpop.permute.xlu0 %1956  ;;  %v1962_v52 = vpop.permute.xlu1 %1961 }
 0x1b8   : > { %v1959_v54 = vunpack.i.h.bf16 %v1957_v29  ;;  %v1958_v56 = vunpack.i.l.bf16 %v1957_v29  ;;  %v1964_v3 = vunpack.i.h.bf16 %v1962_v52  ;;  %v1963_v60 = vunpack.i.l.bf16 %v1962_v52 }
 0x1b9   : > { %943 = vmatpush.bf16.msra.mxu0 %v868_v31 }
 0x1ba   : > { %918 = vmatpush.bf16.msrb.mxu1 %v864_v47  ;;  %v755_v62 = vsel %vm750_vm9, %v1963_v60, %v1913_v30  ;;  %v756_v63 = vsel %vm750_vm9, %v1964_v3, %v1914_v1  ;;  %v753_v6 = vsel %vm750_vm9, %v1913_v30, %v1958_v56  ;;  %v754_v41 = vsel %vm750_vm9, %v1914_v1, %v1959_v54 }
 0x1bb   : > { %v857_v0 = vpack.c.bf16 %v756_v63, %v755_v62  ;;  %v751_v42 = vsel %vm750_vm9, %v1958_v56, %v1963_v60  ;;  %v752_v47 = vsel %vm750_vm9, %v1959_v54, %v1964_v3  ;;  %v858_v9 = vpack.c.bf16 %v754_v41, %v753_v6 }
 0x1bc   : > { %v859_v11 = vpack.c.bf16 %v752_v47, %v751_v42 }
 0x1bd   : > { %944 = vmatpush.bf16.msra.mxu0 %v865_v59  ;;  %894 = vmatpush.bf16.msra.mxu3 %v857_v0 }
 0x1be   : > { %919 = vmatpush.bf16.msrb.mxu1 %v861_v4 }
 0x1bf   : > { %v1982_v59 = vpop.permute.xlu0 %1981  ;;  %v1967_v8 = vpop.permute.xlu1 %1966 }
 0x1c0   : > { %v1984_v12 = vunpack.i.h.bf16 %v1982_v59  ;;  %v1983_v13 = vunpack.i.l.bf16 %v1982_v59  ;;  %v1969_v15 = vunpack.i.h.bf16 %v1967_v8  ;;  %v1968_v20 = vunpack.i.l.bf16 %v1967_v8 }
 0x1c1   : > { %945 = vmatpush.bf16.msra.mxu0 %v862_v5  ;;  %1816 = vmatmul.msk.bf16.vlgmr.msra.gmra.mxu2 %vm885_vm8, %v2508_v17  ;;  %v882_v17 = vpack.c.b16 %v880_v34, %v880_v34 }
 0x1c2   : > { %920 = vmatpush.bf16.msrb.mxu1 %v858_v9  ;;  %v736_v48 = vsel %vm605_vm1, %v1968_v20, %v1923_v58  ;;  %v737_v50 = vsel %vm605_vm1, %v1969_v15, %v1924_v57  ;;  %v734_v55 = vsel %vm605_vm1, %v1923_v58, %v1983_v13  ;;  %v735_v14 = vsel %vm605_vm1, %v1924_v57, %v1984_v12 }
 0x1c3   : > { %v854_v21 = vpack.c.bf16 %v737_v50, %v736_v48  ;;  %v855_v22 = vpack.c.bf16 %v735_v14, %v734_v55  ;;  %v732_v16 = vsel %vm605_vm1, %v1983_v13, %v1968_v20  ;;  %v733_v23 = vsel %vm605_vm1, %v1984_v12, %v1969_v15  ;;  %v993_v48 = vld [vmem:[%s3115_s9] sm:$0xff] }
 0x1c4   : > { %v856_v26 = vpack.c.bf16 %v733_v23, %v732_v16  ;;  %v992_v50 = vld [vmem:[%s3114_s8] sm:$0xff] }
 0x1c5   : > { %946 = vmatpush.bf16.msra.mxu0 %v859_v11  ;;  %895 = vmatpush.bf16.msra.mxu3 %v854_v21 }
 0x1c6   : > { %921 = vmatpush.bf16.msrb.mxu1 %v855_v22 }
 0x1c7   : > { %v1972_v19 = vpop.permute.xlu1 %1971  ;;  %v978_v63 = vpop.permute.xlu0 %977 }
 0x1c8   : > { %v1974_v18 = vunpack.i.h.bf16 %v1972_v19  ;;  %v1973_v33 = vunpack.i.l.bf16 %v1972_v19 }
 0x1c9   : > { %947 = vmatpush.bf16.msra.mxu0 %v856_v26 }
 0x1ca   : > { %v718_v35 = vsel %vm615_vm2, %v1978_v32, %v1973_v33  ;;  %v719_v2 = vsel %vm615_vm2, %v1979_v27, %v1974_v18 }
 0x1cb   : > { %v851_v36 = vpack.c.bf16 %v719_v2, %v718_v35 }
 0x1cd   : > { %896 = vmatpush.bf16.msra.mxu3 %v851_v36 }
 0x1cf   : > { %v1987_v37 = vpop.permute.xlu1 %1986 }
 0x1d0   : > { %v1989_v39 = vunpack.i.h.bf16 %v1987_v37  ;;  %v1988_v40 = vunpack.i.l.bf16 %v1987_v37  ;;  %897 = vmatmul.bf16.vlgmr.msra.gmra.mxu3 %v882_v17 }
 0x1d2   : > { %v716_v44 = vsel %vm615_vm2, %v1973_v33, %v1988_v40  ;;  %v717_v10 = vsel %vm615_vm2, %v1974_v18, %v1989_v39  ;;  %v714_v49 = vsel %vm615_vm2, %v1988_v40, %v1978_v32  ;;  %v715_v45 = vsel %vm615_vm2, %v1989_v39, %v1979_v27 }
 0x1d3   : > { %v852_v31 = vpack.c.bf16 %v717_v10, %v716_v44  ;;  %v853_v1 = vpack.c.bf16 %v715_v45, %v714_v49 }
 0x1d5   : > { %922 = vmatpush.bf16.msrb.mxu1 %v852_v31  ;;  %948 = vmatpush.bf16.msra.mxu0 %v853_v1 }
 0x1d8   : > { %923 = vmatmul.bf16.vlgmr.msrb.gmra.mxu1 %v882_v17  ;;  %949 = vmatmul.bf16.vlgmr.msra.gmra.mxu0 %v882_v17 }
 0x208   : > { %v970_v54 = vpop.permute.xlu2 %969 }
 0x22d   : > { %v911_v30 = vpop.f32.mrf.mxu0 }
 0x234   : > { %v937_v29 = vpop.f32.mrf.mxu2 }
 0x235   : > { %v913_v46 = vpop.f32.mrf.mxu0 }
 0x23c   : > { %v939_v52 = vpop.f32.mrf.mxu2 }
 0x244   : > { %v963_v25 = vpop.f32.mrf.mxu2 }
 0x24c   : > { %v965_v28 = vpop.f32.mrf.mxu2 }
 0x253   : > { %v898_v53 = vpop.f32.mrf.mxu3 }
 0x254   : > { %v912_v56 = vadd.f32 %v911_v30, %v898_v53 }
 0x255   : > { %v924_v3 = vpop.f32.mrf.mxu1  ;;  %v950_v60 = vpop.f32.mrf.mxu0 }
 0x256   : > { %v972_v61 = vmul.f32 %v970_v54, %v912_v56  ;;  %v938_v62 = vadd.f32 %v937_v29, %v924_v3  ;;  %v964_v5 = vadd.f32 %v963_v25, %v950_v60 }
 0x258   : > { %v980_v0 = vadd.f32 %v978_v63, %v972_v61  ;;  %v973_v4 = vmul.f32 %v970_v54, %v938_v62  ;;  %v974_v57 = vmul.f32 %v970_v54, %v964_v5 }
 0x25a   : > { %v983_v6 = vmax.f32 %v980_v0, 0.0  ;;  %v981_v41 = vadd.f32 %v978_v63, %v973_v4  ;;  %v982_v11 = vadd.f32 %v978_v63, %v974_v57 }
 0x25b   : > { %v900_v42 = vpop.f32.mrf.mxu3 }
 0x25c   : > { %v984_v47 = vmax.f32 %v981_v41, 0.0  ;;  %v2600_v8 = vmul.f32 %v983_v6, %v2374_v43  ;;  %v985_v13 = vmax.f32 %v982_v11, 0.0 }
 0x25d   : > { %v926_v58 = vpop.f32.mrf.mxu1  ;;  %v952_v59 = vpop.f32.mrf.mxu0 }
 0x25e   : > { %v2603_v9 = vmul.f32 %v984_v47, %v2367_v38  ;;  %v2611_v15 = vmul.f32 %v985_v13, %v2386_v51 }
 0x260   : > { %v2001_v12 = vpack.i.bf16 %v2603_v9, %v2600_v8  ;;  %v2016_v20 = vpack.i.bf16 %v2611_v15, %v2600_v8 }
 0x262   : > { %2002 = vrot.lane.b32.xlu0 %v2001_v12, %s2216_s1  ;;  %1997 = vrot.lane.b32.xlu2 %v2001_v12, %s2218_s21 }
 0x263   : > { %1992 = vrot.lane.b32.xlu1 %v2001_v12, %s3124_s23 }
 0x26a   : > { %1046 = vrot.lane.b32.xlu0 %v2611_v15, %s2218_s21  ;;  %2007 = vrot.lane.b32.xlu2 %v2001_v12, %s2219_s22 }
 0x26b   : > { %1064 = vrot.lane.b32.xlu1 %v2611_v15, %s3124_s23 }
 0x272   : > { %2017 = vrot.lane.b32.xlu0 %v2016_v20, %s2214_s19  ;;  %2012 = vrot.lane.b32.xlu2 %v2016_v20, %s2217_s20 }
 0x273   : > { %1055 = vrot.lane.b32.xlu1 %v2611_v15, %s2216_s1 }
 0x27a   : > { %2027 = vrot.lane.b32.xlu0 %v2016_v20, %s2213_s18  ;;  %2022 = vrot.lane.b32.xlu2 %v2016_v20, %s2212_s30 }
 0x27b   : > { %1037 = vrot.lane.b32.xlu1 %v2611_v15, %s2219_s22 }
 0x282   : > { %999 = vrot.lane.b32.xlu0 %v2603_v9, %s2212_s30  ;;  %1026 = vrot.lane.b32.xlu2 %v2603_v9, %s2214_s19 }
 0x283   : > { %1017 = vrot.lane.b32.xlu1 %v2603_v9, %s2217_s20 }
 0x28a   : > { %1148 = vperm.xlu0 %1869, %v993_v48   ;;  %1140 = vperm.xlu2 %1990, %v992_v50  }
 0x28b   : > { %1008 = vrot.lane.b32.xlu1 %v2603_v9, %s2213_s18 }
 0x2bc   : > { %v1998_v55 = vpop.permute.xlu2 %1997 }
 0x2bd   : > { %v2000_v19 = vunpack.i.h.bf16 %v1998_v55  ;;  %v1999_v32 = vunpack.i.l.bf16 %v1998_v55  ;;  %v1084_v55 = vld [vmem:[%s3113_s7] sm:$0xf] }
 0x2bf   : > { %v1049_v37 = vsel %vm806_vm5, %v1999_v32, %v2000_v19 }
 0x2c4   : > { %v2008_v14 = vpop.permute.xlu2 %2007 }
 0x2c5   : > { %v2010_v33 = vunpack.i.h.bf16 %v2008_v14  ;;  %v2009_v34 = vunpack.i.l.bf16 %v2008_v14 }
 0x2c7   : > { %v1040_v31 = vsel %vm787_vm6, %v2009_v34, %v2010_v33 }
 0x2c8   : > { %v1075_v46 = vpack.c.bf16 %v1040_v31, %v2600_v8 }
 0x2cc   : > { %v2013_v39 = vpop.permute.xlu2 %2012 }
 0x2cd   : > { %v2015_v29 = vunpack.i.h.bf16 %v2013_v39  ;;  %v2014_v52 = vunpack.i.l.bf16 %v2013_v39 }
 0x2cf   : > { %v1023_v0 = vsel %vm750_vm9, %v2015_v29, %v2014_v52 }
 0x2d4   : > { %v2003_v21 = vpop.permute.xlu0 %2002  ;;  %v2023_v5 = vpop.permute.xlu2 %2022 }
 0x2d5   : > { %v1993_v22 = vpop.permute.xlu1 %1992  ;;  %v2005_v24 = vunpack.i.h.bf16 %v2003_v21  ;;  %v2004_v26 = vunpack.i.l.bf16 %v2003_v21  ;;  %v2025_v41 = vunpack.i.h.bf16 %v2023_v5  ;;  %v2024_v42 = vunpack.i.l.bf16 %v2023_v5 }
 0x2d6   : > { %v1995_v16 = vunpack.i.h.bf16 %v1993_v22  ;;  %v1994_v23 = vunpack.i.l.bf16 %v1993_v22 }
 0x2d7   : > { %v1058_v2 = vsel %vm825_vm4, %v2004_v26, %v2005_v24  ;;  %v1005_v20 = vsel %vm615_vm2, %v2025_v41, %v2024_v42 }
 0x2d8   : > { %v1067_v27 = vsel %vm844_vm7, %v1994_v23, %v1995_v16  ;;  %v1078_v10 = vpack.c.bf16 %v1058_v2, %v1049_v37 }
 0x2d9   : > { %v1081_v18 = vpack.c.bf16 %v1067_v27, %v1067_v27 }
 0x2db   : > { %v1091_v35 = vsel %vm1089_vm10, %v1081_v18, 0 }
 0x2dc   : > { %1102 = vmatpush.bf16.msrb.mxu3 %v1091_v35  ;;  %v1047_v36 = vpop.permute.xlu0 %1046  ;;  %v1027_v14 = vpop.permute.xlu2 %1026 }
 0x2dd   : > { %v1065_v17 = vpop.permute.xlu1 %1064  ;;  %v1048_v56 = vsel %vm806_vm5, %v2000_v19, %v1047_v36  ;;  %v1050_v3 = vsel %vm806_vm5, %v1047_v36, %v1999_v32 }
 0x2de   : > { %v1066_v40 = vsel %vm844_vm7, %v1995_v16, %v1065_v17  ;;  %v1068_v44 = vsel %vm844_vm7, %v1065_v17, %v1994_v23 }
 0x2df   : > { %v1082_v49 = vpack.c.bf16 %v1066_v40, %v1066_v40  ;;  %v1083_v45 = vpack.c.bf16 %v1068_v44, %v1068_v44 }
 0x2e0   : > { %1103 = vmatpush.bf16.msrb.mxu3 %v1078_v10 }
 0x2e1   : > { %v1094_v1 = vsel %vm1089_vm10, %v1082_v49, 0  ;;  %v1097_v30 = vsel %vm1089_vm10, %v1083_v45, 0 }
 0x2e2   : > { %1115 = vmatpush.bf16.msra.mxu1 %v1094_v1  ;;  %1128 = vmatpush.bf16.msrb.mxu2 %v1097_v30 }
 0x2e4   : > { %1104 = vmatpush.bf16.msrb.mxu3 %v1075_v46  ;;  %v2018_v25 = vpop.permute.xlu0 %2017  ;;  %v1141_v2 = vpop.permute.xlu2 %1140 }
 0x2e5   : > { %v2020_v28 = vunpack.i.h.bf16 %v2018_v25  ;;  %v2019_v53 = vunpack.i.l.bf16 %v2018_v25  ;;  %v1056_v54 = vpop.permute.xlu1 %1055 }
 0x2e6   : > { %v1057_v60 = vsel %vm825_vm4, %v2005_v24, %v1056_v54  ;;  %v1059_v61 = vsel %vm825_vm4, %v1056_v54, %v2004_v26 }
 0x2e7   : > { %v1079_v62 = vpack.c.bf16 %v1057_v60, %v1048_v56  ;;  %v1080_v63 = vpack.c.bf16 %v1059_v61, %v1050_v3  ;;  %v1032_v4 = vsel %vm595_vm0, %v2020_v28, %v2019_v53  ;;  %v1167_v60 = vld [vmem:[%s3117_s11 + $0x8] sm:$0xff]  ;;  %v1166_v61 = vld [vmem:[%s3117_s11] sm:$0xff] }
 0x2e8   : > { %v1072_v6 = vpack.c.bf16 %v1032_v4, %v1023_v0 }
 0x2e9   : > { %1116 = vmatpush.bf16.msra.mxu1 %v1079_v62  ;;  %1129 = vmatpush.bf16.msrb.mxu2 %v1080_v63  ;;  %v1169_v62 = vld [vmem:[%s3118_s12 + $0x8] sm:$0xff] }
 0x2ea   : > { %1105 = vmatpush.bf16.msrb.mxu3 %v1072_v6 }
 0x2ec   : > { %v2028_v47 = vpop.permute.xlu0 %2027 }
 0x2ed   : > { %v2030_v57 = vunpack.i.h.bf16 %v2028_v47  ;;  %v2029_v58 = vunpack.i.l.bf16 %v2028_v47  ;;  %v1038_v59 = vpop.permute.xlu1 %1037 }
 0x2ee   : > { %v1039_v8 = vsel %vm787_vm6, %v2010_v33, %v1038_v59  ;;  %v1041_v11 = vsel %vm787_vm6, %v1038_v59, %v2009_v34 }
 0x2ef   : > { %v1076_v12 = vpack.c.bf16 %v1039_v8, %v2603_v9  ;;  %v1077_v13 = vpack.c.bf16 %v1041_v11, %v2611_v15  ;;  %v1014_v48 = vsel %vm605_vm1, %v2030_v57, %v2029_v58  ;;  %v1030_v9 = vsel %vm595_vm0, %v1027_v14, %v2020_v28 }
 0x2f0   : > { %v1069_v50 = vpack.c.bf16 %v1014_v48, %v1005_v20  ;;  %v1031_v15 = vsel %vm595_vm0, %v2019_v53, %v1027_v14  ;;  %v1168_v14 = vld [vmem:[%s3118_s12] sm:$0xff] }
 0x2f1   : > { %1117 = vmatpush.bf16.msra.mxu1 %v1076_v12  ;;  %1130 = vmatpush.bf16.msrb.mxu2 %v1077_v13 }
 0x2f2   : > { %1106 = vmatpush.bf16.msrb.mxu3 %v1069_v50 }
 0x2f4   : > { %v1000_v26 = vpop.permute.xlu0 %999 }
 0x2f5   : > { %v1018_v21 = vpop.permute.xlu1 %1017  ;;  %1817 = vmatmul.msk.bf16.vlgmr.msrb.gmra.mxu3 %vm1085_vm11, %v1084_v55  ;;  %v1003_v19 = vsel %vm615_vm2, %v1000_v26, %v2025_v41  ;;  %v1004_v32 = vsel %vm615_vm2, %v2024_v42, %v1000_v26 }
 0x2f6   : > { %v1021_v22 = vsel %vm750_vm9, %v1018_v21, %v2015_v29  ;;  %v1022_v16 = vsel %vm750_vm9, %v2014_v52, %v1018_v21 }
 0x2f7   : > { %v1073_v23 = vpack.c.bf16 %v1031_v15, %v1022_v16  ;;  %v1074_v24 = vpack.c.bf16 %v1030_v9, %v1021_v22 }
 0x2f9   : > { %1118 = vmatpush.bf16.msra.mxu1 %v1073_v23  ;;  %1131 = vmatpush.bf16.msrb.mxu2 %v1074_v24 }
 0x2fc   : > { %v1149_v37 = vpop.permute.xlu0 %1148 }
 0x2fd   : > { %v1009_v27 = vpop.permute.xlu1 %1008 }
 0x2fe   : > { %v1012_v18 = vsel %vm605_vm1, %v1009_v27, %v2030_v57  ;;  %v1013_v33 = vsel %vm605_vm1, %v2029_v58, %v1009_v27 }
 0x2ff   : > { %v1070_v34 = vpack.c.bf16 %v1013_v33, %v1004_v32  ;;  %v1071_v35 = vpack.c.bf16 %v1012_v18, %v1003_v19 }
 0x301   : > { %1119 = vmatpush.bf16.msra.mxu1 %v1070_v34  ;;  %1132 = vmatpush.bf16.msrb.mxu2 %v1071_v35 }
 0x304   : > { %1818 = vmatmul.msk.bf16.vlgmr.msra.gmra.mxu1 %vm1085_vm11, %v1084_v55  ;;  %1819 = vmatmul.msk.bf16.vlgmr.msrb.gmra.mxu2 %vm1085_vm11, %v1084_v55 }
 0x378   : > { %v1108_v36 = vpop.f32.mrf.mxu3 }
 0x379   : > { %v1143_v17 = vmul.f32 %v1141_v2, %v1108_v36 }
 0x37b   : > { %v1151_v39 = vadd.f32 %v1149_v37, %v1143_v17 }
 0x37d   : > { %v1154_v40 = vmax.f32 %v1151_v39, 0.0 }
 0x37f   : > { %v2707_v44 = vmul.f32 %v1154_v40, %v2374_v43 }
 0x380   : > { %v1110_v10 = vpop.f32.mrf.mxu3 }
 0x381   : > { %1160 = vst [vmem:[%s576_s0] sm:$0xff] %v2707_v44  ;;  %v1121_v49 = vpop.f32.mrf.mxu1 }
 0x382   : > { %v1144_v45 = vmul.f32 %v1141_v2, %v1121_v49 }
 0x384   : > { %v1152_v31 = vadd.f32 %v1149_v37, %v1144_v45 }
 0x386   : > { %v1155_v1 = vmax.f32 %v1152_v31, 0.0 }
 0x387   : > { %v1134_v30 = vpop.f32.mrf.mxu2 }
 0x388   : > { %v2711_v46 = vmul.f32 %v1155_v1, %v2367_v38  ;;  %v1145_v29 = vmul.f32 %v1141_v2, %v1134_v30 }
 0x389   : > { %v1123_v52 = vpop.f32.mrf.mxu1 }
 0x38a   : > { %1161 = vst [vmem:[%s576_s0 + $0x8] sm:$0xff] %v2711_v46  ;;  %v1153_v25 = vadd.f32 %v1149_v37, %v1145_v29  ;;  %1193 = vrot.lane.b32.xlu1 %v2711_v46, %s2217_s20  ;;  %v2041_v28 = vpack.i.bf16 %v2711_v46, %v2707_v44 }
 0x38c   : > { %v1156_v53 = vmax.f32 %v1153_v25, 0.0  ;;  %2042 = vrot.lane.b32.xlu0 %v2041_v28, %s2216_s1  ;;  %2037 = vrot.lane.b32.xlu2 %v2041_v28, %s2218_s21 }
 0x38e   : > { %v2721_v54 = vmul.f32 %v1156_v53, %v2386_v51 }
 0x38f   : > { %v1136_v56 = vpop.f32.mrf.mxu2 }
 0x390   : > { %1162 = vst [vmem:[%s576_s0 + $0x10] sm:$0xff] %v2721_v54  ;;  %v2056_v3 = vpack.i.bf16 %v2721_v54, %v2707_v44 }
 0x392   : > { %2032 = vrot.lane.b32.xlu1 %v2041_v28, %s3124_s23 }
 0x394   : > { %1222 = vrot.lane.b32.xlu0 %v2721_v54, %s2218_s21  ;;  %2047 = vrot.lane.b32.xlu2 %v2041_v28, %s2219_s22 }
 0x39a   : > { %1240 = vrot.lane.b32.xlu1 %v2721_v54, %s3124_s23 }
 0x39c   : > { %2057 = vrot.lane.b32.xlu0 %v2056_v3, %s2214_s19  ;;  %2052 = vrot.lane.b32.xlu2 %v2056_v3, %s2217_s20 }
 0x3a2   : > { %1231 = vrot.lane.b32.xlu1 %v2721_v54, %s2216_s1 }
 0x3a4   : > { %2067 = vrot.lane.b32.xlu0 %v2056_v3, %s2213_s18  ;;  %2062 = vrot.lane.b32.xlu2 %v2056_v3, %s2212_s30 }
 0x3aa   : > { %1213 = vrot.lane.b32.xlu1 %v2721_v54, %s2219_s22 }
 0x3ac   : > { %1175 = vrot.lane.b32.xlu0 %v2711_v46, %s2212_s30  ;;  %1202 = vrot.lane.b32.xlu2 %v2711_v46, %s2214_s19 }
 0x3b2   : > { %1184 = vrot.lane.b32.xlu1 %v2711_v46, %s2213_s18 }
 0x3b4   : > { %1328 = vperm.xlu0 %1869, %v1167_v60   ;;  %1323 = vperm.xlu2 %1990, %v1166_v61   ;;  %v1835_v60 = vld [vmem:[%s3116_s10] sm:$0xff] }
 0x3ba   : > { %1339 = vperm.xlu1 %2071, %v1168_v14  }
 0x3bc   : > { %1344 = vperm.xlu2 %1990, %v1169_v62  }
 0x3e6   : > { %v2038_v63 = vpop.permute.xlu2 %2037 }
 0x3e7   : > { %v2040_v11 = vunpack.i.h.bf16 %v2038_v63  ;;  %v2039_v12 = vunpack.i.l.bf16 %v2038_v63 }
 0x3e9   : > { %v1225_v9 = vsel %vm806_vm5, %v2039_v12, %v2040_v11 }
 0x3ee   : > { %v2757_v4 = vpop.permute.xlu2 %2047 }
 0x3ef   : > { %v2050_v20 = vunpack.i.h.bf16 %v2757_v4  ;;  %v2049_v48 = vunpack.i.l.bf16 %v2757_v4 }
 0x3f1   : > { %v1216_v27 = vsel %vm787_vm6, %v2049_v48, %v2050_v20 }
 0x3f2   : > { %v1251_v36 = vpack.c.bf16 %v1216_v27, %v2707_v44 }
 0x3f6   : > { %v2759_v59 = vpop.permute.xlu2 %2052 }
 0x3f7   : > { %v2055_v18 = vunpack.i.h.bf16 %v2759_v59  ;;  %v2054_v33 = vunpack.i.l.bf16 %v2759_v59 }
 0x3f9   : > { %v1199_v49 = vsel %vm750_vm9, %v2055_v18, %v2054_v33 }
 0x3fc   : > { %v2755_v0 = vpop.permute.xlu1 %1193 }
 0x3fe   : > { %v2043_v5 = vpop.permute.xlu0 %2042  ;;  %v2063_v2 = vpop.permute.xlu2 %2062 }
 0x3ff   : > { %v2045_v47 = vunpack.i.h.bf16 %v2043_v5  ;;  %v2044_v57 = vunpack.i.l.bf16 %v2043_v5  ;;  %v2065_v37 = vunpack.i.h.bf16 %v2063_v2  ;;  %v2064_v39 = vunpack.i.l.bf16 %v2063_v2 }
 0x401   : > { %v1234_v55 = vsel %vm825_vm4, %v2044_v57, %v2045_v47  ;;  %v1181_v53 = vsel %vm615_vm2, %v2065_v37, %v2064_v39 }
 0x402   : > { %v1254_v16 = vpack.c.bf16 %v1234_v55, %v1225_v9 }
 0x404   : > { %v2033_v6 = vpop.permute.xlu1 %2032 }
 0x405   : > { %v2035_v41 = vunpack.i.h.bf16 %v2033_v6  ;;  %v2034_v42 = vunpack.i.l.bf16 %v2033_v6 }
 0x406   : > { %v1223_v58 = vpop.permute.xlu0 %1222  ;;  %v1203_v4 = vpop.permute.xlu2 %1202 }
 0x407   : > { %v1243_v8 = vsel %vm844_vm7, %v2034_v42, %v2035_v41  ;;  %v1224_v40 = vsel %vm806_vm5, %v2040_v11, %v1223_v58  ;;  %v1226_v45 = vsel %vm806_vm5, %v1223_v58, %v2039_v12 }
 0x408   : > { %v1257_v13 = vpack.c.bf16 %v1243_v8, %v1243_v8 }
 0x40a   : > { %v1271_v50 = vsel %vm1089_vm10, %v1257_v13, 0 }
 0x40b   : > { %1282 = vmatpush.bf16.msra.mxu3 %v1271_v50 }
 0x40c   : > { %v1241_v21 = vpop.permute.xlu1 %1240 }
 0x40d   : > { %v1242_v15 = vsel %vm844_vm7, %v2035_v41, %v1241_v21  ;;  %v1244_v22 = vsel %vm844_vm7, %v1241_v21, %v2034_v42 }
 0x40e   : > { %v1258_v23 = vpack.c.bf16 %v1242_v15, %v1242_v15  ;;  %v1259_v24 = vpack.c.bf16 %v1244_v22, %v1244_v22  ;;  %v2058_v26 = vpop.permute.xlu0 %2057 }
 0x40f   : > { %v2060_v19 = vunpack.i.h.bf16 %v2058_v26  ;;  %v2059_v32 = vunpack.i.l.bf16 %v2058_v26  ;;  %1283 = vmatpush.bf16.msra.mxu3 %v1254_v16 }
 0x410   : > { %v1274_v34 = vsel %vm1089_vm10, %v1258_v23, 0  ;;  %v1277_v35 = vsel %vm1089_vm10, %v1259_v24, 0 }
 0x411   : > { %1296 = vmatpush.bf16.msrb.mxu0 %v1274_v34  ;;  %1310 = vmatpush.bf16.msrb.mxu1 %v1277_v35  ;;  %v1208_v17 = vsel %vm595_vm0, %v2060_v19, %v2059_v32  ;;  %v1207_v41 = vsel %vm595_vm0, %v2059_v32, %v1203_v4  ;;  %v1206_v42 = vsel %vm595_vm0, %v1203_v4, %v2060_v19 }
 0x412   : > { %v1248_v1 = vpack.c.bf16 %v1208_v17, %v1199_v49 }
 0x413   : > { %1284 = vmatpush.bf16.msra.mxu3 %v1251_v36 }
 0x414   : > { %v1232_v10 = vpop.permute.xlu1 %1231 }
 0x415   : > { %v1233_v31 = vsel %vm825_vm4, %v2045_v47, %v1232_v10  ;;  %v1235_v44 = vsel %vm825_vm4, %v1232_v10, %v2044_v57  ;;  %v1197_v47 = vsel %vm750_vm9, %v2755_v0, %v2055_v18 }
 0x416   : > { %v1255_v30 = vpack.c.bf16 %v1233_v31, %v1224_v40  ;;  %v1256_v29 = vpack.c.bf16 %v1235_v44, %v1226_v45  ;;  %v2068_v52 = vpop.permute.xlu0 %2067  ;;  %v1250_v58 = vpack.c.bf16 %v1206_v42, %v1197_v47 }
 0x417   : > { %v2070_v25 = vunpack.i.h.bf16 %v2068_v52  ;;  %v2069_v28 = vunpack.i.l.bf16 %v2068_v52  ;;  %1285 = vmatpush.bf16.msra.mxu3 %v1248_v1 }
 0x418   : > { %1297 = vmatpush.bf16.msrb.mxu0 %v1255_v30  ;;  %1311 = vmatpush.bf16.msrb.mxu1 %v1256_v29 }
 0x419   : > { %v1190_v56 = vsel %vm605_vm1, %v2070_v25, %v2069_v28 }
 0x41a   : > { %v1245_v3 = vpack.c.bf16 %v1190_v56, %v1181_v53 }
 0x41c   : > { %v1214_v61 = vpop.permute.xlu1 %1213  ;;  %1286 = vmatpush.bf16.msra.mxu3 %v1245_v3 }
 0x41d   : > { %v1215_v62 = vsel %vm787_vm6, %v2050_v20, %v1214_v61  ;;  %v1217_v63 = vsel %vm787_vm6, %v1214_v61, %v2049_v48  ;;  %v1324_v48 = vpop.permute.xlu2 %1323 }
 0x41e   : > { %v1252_v5 = vpack.c.bf16 %v1215_v62, %v2711_v46  ;;  %v1253_v6 = vpack.c.bf16 %v1217_v63, %v2721_v54  ;;  %v1198_v46 = vsel %vm750_vm9, %v2054_v33, %v2755_v0  ;;  %v1176_v57 = vpop.permute.xlu0 %1175 }
 0x41f   : > { %1824 = vmatmul.msk.bf16.vlgmr.msra.gmra.mxu3 %vm1085_vm11, %v1835_v60  ;;  %v1249_v54 = vpack.c.bf16 %v1207_v41, %v1198_v46  ;;  %v1179_v8 = vsel %vm615_vm2, %v1176_v57, %v2065_v37  ;;  %v1180_v11 = vsel %vm615_vm2, %v2064_v39, %v1176_v57 }
 0x420   : > { %1298 = vmatpush.bf16.msrb.mxu0 %v1252_v5  ;;  %1312 = vmatpush.bf16.msrb.mxu1 %v1253_v6 }
 0x424   : > { %v1185_v59 = vpop.permute.xlu1 %1184  ;;  %1299 = vmatpush.bf16.msrb.mxu0 %v1249_v54  ;;  %1313 = vmatpush.bf16.msrb.mxu1 %v1250_v58 }
 0x425   : > { %v1188_v12 = vsel %vm605_vm1, %v1185_v59, %v2070_v25  ;;  %v1189_v13 = vsel %vm605_vm1, %v2069_v28, %v1185_v59  ;;  %v1345_v24 = vpop.permute.xlu2 %1344 }
 0x426   : > { %v1246_v20 = vpack.c.bf16 %v1189_v13, %v1180_v11  ;;  %v1247_v0 = vpack.c.bf16 %v1188_v12, %v1179_v8  ;;  %v1329_v15 = vpop.permute.xlu0 %1328 }
 0x428   : > { %1300 = vmatpush.bf16.msrb.mxu0 %v1246_v20  ;;  %1314 = vmatpush.bf16.msrb.mxu1 %v1247_v0 }
 0x42b   : > { %1825 = vmatmul.msk.bf16.vlgmr.msrb.gmra.mxu0 %vm1085_vm11, %v1835_v60  ;;  %1826 = vmatmul.msk.bf16.vlgmr.msrb.gmra.mxu1 %vm1085_vm11, %v1835_v60 }
 0x42c   : > { %v1340_v9 = vpop.permute.xlu1 %1339 }
 0x4a2   : > { %v1288_v50 = vpop.f32.mrf.mxu3 }
 0x4a3   : > { %v1331_v55 = vmul.f32 %v1324_v48, %v1288_v50 }
 0x4a5   : > { %v1347_v26 = vadd.f32 %v1340_v9, %v1331_v55 }
 0x4a7   : > { %v1353_v33 = vmax.f32 %v1347_v26, 0.0 }
 0x4a8   : > { %v1302_v14 = vpop.f32.mrf.mxu0  ;;  %v1316_v21 = vpop.f32.mrf.mxu1 }
 0x4a9   : > { %v1332_v16 = vmul.f32 %v1324_v48, %v1302_v14  ;;  %v1333_v32 = vmul.f32 %v1324_v48, %v1316_v21  ;;  %v2834_v49 = vmul.f32 %v1353_v33, %v2374_v43 }
 0x4aa   : > { %v1290_v22 = vpop.f32.mrf.mxu3 }
 0x4ab   : > { %v1334_v23 = vmul.f32 %v1329_v15, %v1290_v22  ;;  %v1348_v19 = vadd.f32 %v1340_v9, %v1332_v16  ;;  %v1349_v39 = vadd.f32 %v1340_v9, %v1333_v32 }
 0x4ad   : > { %v1350_v27 = vadd.f32 %v1345_v24, %v1334_v23  ;;  %v1354_v37 = vmax.f32 %v1348_v19, 0.0  ;;  %v1355_v30 = vmax.f32 %v1349_v39, 0.0 }
 0x4af   : > { %v1356_v18 = vmax.f32 %v1350_v27, 0.0  ;;  %v2839_v1 = vmul.f32 %v1354_v37, %v2367_v38 }
 0x4b0   : > { %v1304_v34 = vpop.f32.mrf.mxu0  ;;  %v1318_v35 = vpop.f32.mrf.mxu1 }
 0x4b1   : > { %v1335_v2 = vmul.f32 %v1329_v15, %v1304_v34  ;;  %v1336_v36 = vmul.f32 %v1329_v15, %v1318_v35  ;;  %v2831_v17 = vmul.f32 %v1356_v18, %v2374_v43  ;;  %v2850_v43 = vmul.f32 %v1355_v30, %v2386_v51 }
 0x4b3   : > { %v1351_v40 = vadd.f32 %v1345_v24, %v1335_v2  ;;  %v1352_v10 = vadd.f32 %v1345_v24, %v1336_v36  ;;  %v1534_v44 = vpack.c.bf16 %v2831_v17, %v2834_v49  ;;  %v2127_v56 = vpack.i.bf16 %v2831_v17, %v2834_v49 }
 0x4b5   : > { %v1357_v45 = vmax.f32 %v1351_v40, 0.0  ;;  %v1358_v31 = vmax.f32 %v1352_v10, 0.0 }
 0x4b7   : > { %v2842_v29 = vmul.f32 %v1357_v45, %v2367_v38  ;;  %v2845_v52 = vmul.f32 %v1358_v31, %v2386_v51  ;;  %v1371_v51 = vld [vmem:[%s3120_s14] sm:$0xff] }
 0x4b9   : > { %v2082_v25 = vpack.i.bf16 %v2842_v29, %v2839_v1  ;;  %v1535_v28 = vpack.c.bf16 %v2842_v29, %v2839_v1  ;;  %v1536_v38 = vpack.c.bf16 %v2845_v52, %v2850_v43  ;;  %v2092_v53 = vpack.i.bf16 %v2845_v52, %v2850_v43 }
 0x4bb   : > { %2083 = vrot.lane.b32.xlu2 %v2082_v25, %s2219_s22  ;;  %2078 = vrot.lane.b32.xlu0 %v2082_v25, %s2218_s21 }
 0x4bc   : > { %2073 = vrot.lane.b32.xlu1 %v2082_v25, %s2216_s1 }
 0x4c3   : > { %2093 = vrot.lane.b32.xlu2 %v2092_v53, %s2214_s19  ;;  %2088 = vrot.lane.b32.xlu0 %v2092_v53, %s2216_s1 }
 0x4c4   : > { %2128 = vrot.lane.b32.xlu1 %v2127_v56, %s2219_s22 }
 0x4cb   : > { %2108 = vrot.lane.b32.xlu2 %v2127_v56, %s2218_s21  ;;  %2098 = vrot.lane.b32.xlu0 %v2127_v56, %s2216_s1  ;;  %s3130_s1 = smov 109  }
 0x4cc   : > { %2133 = vrot.lane.b32.xlu1 %v2127_v56, %s2214_s19 }
 0x4d3   : > { %2113 = vrot.lane.b32.xlu2 %v2092_v53, %s2217_s20  ;;  %2103 = vrot.lane.b32.xlu0 %v2092_v53, %s2218_s21 }
 0x4d4   : > { %2138 = vrot.lane.b32.xlu1 %v2127_v56, %s2217_s20 }
 0x4db   : > { %2123 = vrot.lane.b32.xlu2 %v2092_v53, %s2213_s18  ;;  %2118 = vrot.lane.b32.xlu0 %v2092_v53, %s2219_s22 }
 0x4dc   : > { %2143 = vrot.lane.b32.xlu1 %v2127_v56, %s2213_s18 }
 0x4e3   : > { %2153 = vrot.lane.b32.xlu2 %v2082_v25, %s2214_s19  ;;  %2158 = vrot.lane.b32.xlu0 %v2127_v56, %s2212_s30 }
 0x4e4   : > { %2148 = vrot.lane.b32.xlu1 %v2092_v53, %s2212_s30 }
 0x4eb   : > { %2168 = vrot.lane.b32.xlu2 %v2082_v25, %s3130_s1  ;;  %2163 = vrot.lane.b32.xlu0 %v2082_v25, %s2217_s20 }
 0x4ec   : > { %2178 = vrot.lane.b32.xlu1 %v2127_v56, %s3130_s1 }
 0x4f3   : > { %2188 = vrot.lane.b32.xlu2 %v2092_v53, %s3130_s1  ;;  %2173 = vrot.lane.b32.xlu0 %v2082_v25, %s2213_s18 }
 0x4f4   : > { %2183 = vrot.lane.b32.xlu1 %v2082_v25, %s2212_s30 }
 0x4fb   : > { %1552 = vperm.xlu0 %1869, %v1371_v51  }
 0x515   : > { %v2887_v3 = vpop.permute.xlu2 %2083 }
 0x516   : > { %v2086_v24 = vunpack.i.h.bf16 %v2887_v3  ;;  %v2085_v26 = vunpack.i.l.bf16 %v2887_v3 }
 0x51d   : > { %v2889_v60 = vpop.permute.xlu2 %2093 }
 0x51e   : > { %v2096_v51 = vunpack.i.h.bf16 %v2889_v60  ;;  %v2095_v3 = vunpack.i.l.bf16 %v2889_v60 }
 0x525   : > { %v2109_v61 = vpop.permute.xlu2 %2108 }
 0x526   : > { %v2111_v48 = vunpack.i.h.bf16 %v2109_v61  ;;  %v2110_v50 = vunpack.i.l.bf16 %v2109_v61 }
 0x52d   : > { %v2079_v62 = vpop.permute.xlu0 %2078  ;;  %v2891_v4 = vpop.permute.xlu2 %2113 }
 0x52e   : > { %v2074_v63 = vpop.permute.xlu1 %2073  ;;  %v2081_v11 = vunpack.i.h.bf16 %v2079_v62  ;;  %v2080_v12 = vunpack.i.l.bf16 %v2079_v62 }
 0x52f   : > { %v2076_v6 = vunpack.i.h.bf16 %v2074_v63  ;;  %v2075_v41 = vunpack.i.l.bf16 %v2074_v63 }
 0x530   : > { %v1482_v27 = vsel %vm806_vm5, %v2110_v50, %v2080_v12  ;;  %v1483_v19 = vsel %vm806_vm5, %v2111_v48, %v2081_v11 }
 0x531   : > { %v1540_v35 = vpack.c.bf16 %v1483_v19, %v1482_v27 }
 0x535   : > { %v2089_v5 = vpop.permute.xlu0 %2088  ;;  %v2899_v59 = vpop.permute.xlu2 %2123 }
 0x536   : > { %v2893_v42 = vpop.permute.xlu1 %2128  ;;  %v2091_v47 = vunpack.i.h.bf16 %v2089_v5  ;;  %v2090_v46 = vunpack.i.l.bf16 %v2089_v5 }
 0x537   : > { %v2131_v55 = vunpack.i.h.bf16 %v2893_v42  ;;  %v2130_v14 = vunpack.i.l.bf16 %v2893_v42 }
 0x538   : > { %v1499_v57 = vsel %vm825_vm4, %v2076_v6, %v2091_v47  ;;  %v1498_v54 = vsel %vm825_vm4, %v2075_v41, %v2090_v46 }
 0x539   : > { %v1544_v58 = vpack.c.bf16 %v1499_v57, %v1498_v54  ;;  %v1464_v18 = vsel %vm787_vm6, %v2130_v14, %v2085_v26  ;;  %v1465_v33 = vsel %vm787_vm6, %v2131_v55, %v2086_v24  ;;  %v2115_v57 = vunpack.i.l.bf16 %v2891_v4 }
 0x53a   : > { %v1537_v39 = vpack.c.bf16 %v1465_v33, %v1464_v18 }
 0x53b   : > { %1590 = vmatpush.bf16.msra.mxu0 %v1544_v58 }
 0x53d   : > { %v2099_v8 = vpop.permute.xlu0 %2098  ;;  %v2919_v32 = vpop.permute.xlu2 %2153 }
 0x53e   : > { %v2901_v13 = vpop.permute.xlu1 %2133  ;;  %v2101_v20 = vunpack.i.h.bf16 %v2099_v8  ;;  %v2100_v0 = vunpack.i.l.bf16 %v2099_v8  ;;  %v2156_v54 = vunpack.i.h.bf16 %v2919_v32  ;;  %v2155_v58 = vunpack.i.l.bf16 %v2919_v32 }
 0x53f   : > { %v2136_v30 = vunpack.i.h.bf16 %v2901_v13  ;;  %v2135_v25 = vunpack.i.l.bf16 %v2901_v13 }
 0x540   : > { %v1501_v21 = vsel %vm825_vm4, %v2101_v20, %v2076_v6  ;;  %v1500_v9 = vsel %vm825_vm4, %v2100_v0, %v2075_v41  ;;  %v1502_v15 = vsel %vm825_vm4, %v2090_v46, %v2100_v0  ;;  %v1503_v22 = vsel %vm825_vm4, %v2091_v47, %v2101_v20 }
 0x541   : > { %v1543_v16 = vpack.c.bf16 %v1501_v21, %v1500_v9  ;;  %v1545_v23 = vpack.c.bf16 %v1503_v22, %v1502_v15  ;;  %v1448_v63 = vsel %vm595_vm0, %v2095_v3, %v2135_v25  ;;  %v1449_v5 = vsel %vm595_vm0, %v2096_v51, %v2136_v30 }
 0x542   : > { %v2116_v46 = vunpack.i.h.bf16 %v2891_v4  ;;  %v1531_v8 = vpack.c.bf16 %v1449_v5, %v1448_v63  ;;  %v1446_v15 = vsel %vm595_vm0, %v2135_v25, %v2155_v58  ;;  %v1447_v22 = vsel %vm595_vm0, %v2136_v30, %v2156_v54 }
 0x543   : > { %1564 = vmatpush.bf16.msra.mxu2 %v1543_v16  ;;  %1616 = vmatpush.bf16.msrb.mxu3 %v1545_v23  ;;  %v1444_v18 = vsel %vm595_vm0, %v2155_v58, %v2095_v3  ;;  %v1445_v33 = vsel %vm595_vm0, %v2156_v54, %v2096_v51 }
 0x545   : > { %v2104_v34 = vpop.permute.xlu0 %2103  ;;  %v2945_v41 = vpop.permute.xlu2 %2168 }
 0x546   : > { %v2925_v2 = vpop.permute.xlu1 %2138  ;;  %v2106_v36 = vunpack.i.h.bf16 %v2104_v34  ;;  %v2105_v37 = vunpack.i.l.bf16 %v2104_v34  ;;  %v1549_v34 = vld [vmem:[%s3119_s13] sm:$0xff] }
 0x547   : > { %1565 = vmatpush.bf16.msra.mxu2 %v1540_v35  ;;  %v2140_v61 = vunpack.i.l.bf16 %v2925_v2  ;;  %v2141_v6 = vunpack.i.h.bf16 %v2925_v2 }
 0x548   : > { %v1480_v40 = vsel %vm806_vm5, %v2080_v12, %v2105_v37  ;;  %v1481_v10 = vsel %vm806_vm5, %v2081_v11, %v2106_v36  ;;  %v1484_v45 = vsel %vm806_vm5, %v2105_v37, %v2110_v50  ;;  %v1485_v31 = vsel %vm806_vm5, %v2106_v36, %v2111_v48 }
 0x549   : > { %v1541_v53 = vpack.c.bf16 %v1481_v10, %v1480_v40  ;;  %v1542_v56 = vpack.c.bf16 %v1485_v31, %v1484_v45  ;;  %v1430_v17 = vsel %vm750_vm9, %v2115_v57, %v2140_v61  ;;  %v1431_v50 = vsel %vm750_vm9, %v2116_v46, %v2141_v6 }
 0x54a   : > { %v1528_v9 = vpack.c.bf16 %v1431_v50, %v1430_v17  ;;  %v1532_v37 = vpack.c.bf16 %v1447_v22, %v1446_v15  ;;  %v2170_v40 = vunpack.i.l.bf16 %v2945_v41 }
 0x54b   : > { %1566 = vmatpush.bf16.msra.mxu2 %v1537_v39  ;;  %1591 = vmatpush.bf16.msra.mxu0 %v1541_v53  ;;  %v1533_v39 = vpack.c.bf16 %v1445_v33, %v1444_v18  ;;  %v1557_v53 = vunpack.c.h.b16 %v1549_v34 }
 0x54c   : > { %1617 = vmatpush.bf16.msrb.mxu3 %v1542_v56 }
 0x54d   : > { %v2119_v62 = vpop.permute.xlu0 %2118  ;;  %v2189_v35 = vpop.permute.xlu2 %2188 }
 0x54e   : > { %v2947_v42 = vpop.permute.xlu1 %2143  ;;  %v2121_v47 = vunpack.i.h.bf16 %v2119_v62  ;;  %v2120_v60 = vunpack.i.l.bf16 %v2119_v62  ;;  %v2191_v52 = vunpack.i.h.bf16 %v2189_v35  ;;  %v2190_v43 = vunpack.i.l.bf16 %v2189_v35 }
 0x54f   : > { %1567 = vmatpush.bf16.msra.mxu2 %v1534_v44  ;;  %v2146_v49 = vunpack.i.h.bf16 %v2947_v42  ;;  %v2145_v44 = vunpack.i.l.bf16 %v2947_v42 }
 0x550   : > { %v1462_v11 = vsel %vm787_vm6, %v2085_v26, %v2120_v60  ;;  %v1463_v12 = vsel %vm787_vm6, %v2086_v24, %v2121_v47  ;;  %v1466_v20 = vsel %vm787_vm6, %v2120_v60, %v2130_v14  ;;  %v1467_v0 = vsel %vm787_vm6, %v2121_v47, %v2131_v55 }
 0x551   : > { %v1538_v13 = vpack.c.bf16 %v1463_v12, %v1462_v11  ;;  %v1539_v48 = vpack.c.bf16 %v1467_v0, %v1466_v20  ;;  %v2126_v55 = vunpack.i.h.bf16 %v2899_v59  ;;  %v2125_v14 = vunpack.i.l.bf16 %v2899_v59 }
 0x552   : > { %v1516_v51 = vsel %vm844_vm7, %v2170_v40, %v2190_v43  ;;  %v1559_v11 = vpack.c.b16 %v1557_v53, %v1557_v53 }
 0x553   : > { %1568 = vmatpush.bf16.msra.mxu2 %v1531_v8  ;;  %1592 = vmatpush.bf16.msra.mxu0 %v1538_v13  ;;  %v1412_v26 = vsel %vm605_vm1, %v2125_v14, %v2145_v44  ;;  %v1413_v27 = vsel %vm605_vm1, %v2126_v55, %v2146_v49 }
 0x554   : > { %1618 = vmatpush.bf16.msrb.mxu3 %v1539_v48  ;;  %v1525_v36 = vpack.c.bf16 %v1413_v27, %v1412_v26 }
 0x555   : > { %v2980_v21 = vpop.permute.xlu0 %2158 }
 0x556   : > { %v2986_v16 = vpop.permute.xlu1 %2148  ;;  %v2161_v23 = vunpack.i.h.bf16 %v2980_v21  ;;  %v2160_v24 = vunpack.i.l.bf16 %v2980_v21 }
 0x557   : > { %v2151_v19 = vunpack.i.h.bf16 %v2986_v16  ;;  %v2150_v32 = vunpack.i.l.bf16 %v2986_v16  ;;  %1569 = vmatpush.bf16.msra.mxu2 %v1528_v9  ;;  %1593 = vmatpush.bf16.msra.mxu0 %v1535_v28  ;;  %v1556_v28 = vunpack.c.l.b16 %v1549_v34 }
 0x558   : > { %1619 = vmatpush.bf16.msrb.mxu3 %v1536_v38  ;;  %v2171_v38 = vunpack.i.h.bf16 %v2945_v41 }
 0x559   : > { %v1394_v1 = vsel %vm615_vm2, %v2150_v32, %v2160_v24  ;;  %v1395_v29 = vsel %vm615_vm2, %v2151_v19, %v2161_v23  ;;  %v1558_v56 = vpack.c.b16 %v1556_v28, %v1556_v28 }
 0x55a   : > { %v1522_v45 = vpack.c.bf16 %v1395_v29, %v1394_v1  ;;  %v1517_v3 = vsel %vm844_vm7, %v2171_v38, %v2191_v52 }
 0x55b   : > { %1570 = vmatpush.bf16.msra.mxu2 %v1525_v36  ;;  %1594 = vmatpush.bf16.msra.mxu0 %v1532_v37  ;;  %v1547_v12 = vpack.c.bf16 %v1517_v3, %v1516_v51 }
 0x55c   : > { %1620 = vmatpush.bf16.msrb.mxu3 %v1533_v39 }
 0x55d   : > { %v2164_v10 = vpop.permute.xlu0 %2163 }
 0x55e   : > { %v2179_v31 = vpop.permute.xlu1 %2178  ;;  %v2166_v30 = vunpack.i.h.bf16 %v2164_v10  ;;  %v2165_v25 = vunpack.i.l.bf16 %v2164_v10 }
 0x55f   : > { %v2181_v62 = vunpack.i.h.bf16 %v2179_v31  ;;  %v2180_v63 = vunpack.i.l.bf16 %v2179_v31  ;;  %1571 = vmatpush.bf16.msra.mxu2 %v1522_v45 }
 0x560   : > { %v1428_v5 = vsel %vm750_vm9, %v2140_v61, %v2165_v25  ;;  %v1429_v41 = vsel %vm750_vm9, %v2141_v6, %v2166_v30  ;;  %v1426_v47 = vsel %vm750_vm9, %v2165_v25, %v2115_v57  ;;  %v1427_v60 = vsel %vm750_vm9, %v2166_v30, %v2116_v46 }
 0x561   : > { %v1518_v54 = vsel %vm844_vm7, %v2180_v63, %v2170_v40  ;;  %v1519_v61 = vsel %vm844_vm7, %v2181_v62, %v2171_v38  ;;  %v1520_v2 = vsel %vm844_vm7, %v2190_v43, %v2180_v63  ;;  %v1521_v6 = vsel %vm844_vm7, %v2191_v52, %v2181_v62 }
 0x562   : > { %v1546_v58 = vpack.c.bf16 %v1519_v61, %v1518_v54  ;;  %v1548_v8 = vpack.c.bf16 %v1521_v6, %v1520_v2  ;;  %1572 = vmatmul.bf16.vlgmr.msra.gmra.mxu2 %v1558_v56  ;;  %v1529_v57 = vpack.c.bf16 %v1429_v41, %v1428_v5  ;;  %v1530_v4 = vpack.c.bf16 %v1427_v60, %v1426_v47 }
 0x564   : > { %1584 = vmatpush.bf16.msra.mxu1 %v1546_v58  ;;  %1595 = vmatpush.bf16.msra.mxu0 %v1529_v57 }
 0x565   : > { %1621 = vmatpush.bf16.msrb.mxu3 %v1530_v4  ;;  %1636 = vmatpush.bf16.msrb.mxu2 %v1548_v8  ;;  %v2174_v46 = vpop.permute.xlu0 %2173 }
 0x566   : > { %v2184_v13 = vpop.permute.xlu1 %2183  ;;  %v2176_v20 = vunpack.i.h.bf16 %v2174_v46  ;;  %v2175_v0 = vunpack.i.l.bf16 %v2174_v46 }
 0x567   : > { %v2186_v17 = vunpack.i.h.bf16 %v2184_v13  ;;  %v2185_v48 = vunpack.i.l.bf16 %v2184_v13  ;;  %1827 = vmatmul.msk.bf16.vlgmr.msra.gmra.mxu1 %vm885_vm8, %v1559_v11 }
 0x568   : > { %1610 = vmatpush.bf16.msrb.mxu1 %v1547_v12  ;;  %v1410_v50 = vsel %vm605_vm1, %v2145_v44, %v2175_v0  ;;  %v1411_v9 = vsel %vm605_vm1, %v2146_v49, %v2176_v20  ;;  %v1408_v15 = vsel %vm605_vm1, %v2175_v0, %v2125_v14  ;;  %v1409_v22 = vsel %vm605_vm1, %v2176_v20, %v2126_v55 }
 0x569   : > { %v1526_v26 = vpack.c.bf16 %v1411_v9, %v1410_v50  ;;  %v1527_v27 = vpack.c.bf16 %v1409_v22, %v1408_v15  ;;  %v1392_v42 = vsel %vm615_vm2, %v2160_v24, %v2185_v48  ;;  %v1393_v49 = vsel %vm615_vm2, %v2161_v23, %v2186_v17 }
 0x56a   : > { %v1390_v59 = vsel %vm615_vm2, %v2185_v48, %v2150_v32  ;;  %v1391_v44 = vsel %vm615_vm2, %v2186_v17, %v2151_v19  ;;  %v1523_v55 = vpack.c.bf16 %v1393_v49, %v1392_v42 }
 0x56b   : > { %1596 = vmatpush.bf16.msra.mxu0 %v1526_v26  ;;  %1622 = vmatpush.bf16.msrb.mxu3 %v1527_v27  ;;  %v1524_v14 = vpack.c.bf16 %v1391_v44, %v1390_v59 }
 0x56d   : > { %v1553_v23 = vpop.permute.xlu0 %1552 }
 0x56f   : > { %1597 = vmatpush.bf16.msra.mxu0 %v1523_v55  ;;  %1623 = vmatpush.bf16.msrb.mxu3 %v1524_v14 }
 0x572   : > { %1598 = vmatmul.bf16.vlgmr.msra.gmra.mxu0 %v1558_v56  ;;  %1624 = vmatmul.bf16.vlgmr.msrb.gmra.mxu3 %v1558_v56 }
 0x573   : > { %1829 = vmatmul.msk.bf16.vlgmr.msrb.gmra.mxu2 %vm885_vm8, %v1559_v11 }
 0x577   : > { %1828 = vmatmul.msk.bf16.vlgmr.msrb.gmra.mxu1 %vm885_vm8, %v1559_v11 }
 0x5e4   : > { %v1586_v21 = vpop.f32.mrf.mxu1 }
 0x5e5   : > { %v1573_v24 = vpop.f32.mrf.mxu2 }
 0x5e6   : > { %v1574_v32 = vadd.f32 %v1573_v24, %v1553_v23 }
 0x5e8   : > { %v1587_v16 = vadd.f32 %v1586_v21, %v1574_v32 }
 0x5ea   : > { %v1830_v18 = vmul.f32 -1.442695, %v1587_v16 }
 0x5ec   : > { %2192 = vpow2.f32 %v1830_v18  ;;  %v1588_v7 = vpop.f32.mrf.mxu1 }
 0x5ed   : > { %v1575_v19 = vpop.f32.mrf.mxu2 }
 0x5ef   : > { %v1599_v33 = vpop.f32.mrf.mxu0 }
 0x5f0   : > { %v1600_v36 = vadd.f32 %v1599_v33, %v1553_v23 }
 0x5f2   : > { %v2193_v34 = vpop.eup %2192 }
 0x5f3   : > { %v1651_v35 = vadd.f32 1.0, %v2193_v34 }
 0x5f4   : > { %v1612_v37 = vpop.f32.mrf.mxu1 }
 0x5f5   : > { %2194 = vrcp.f32 %v1651_v35  ;;  %v1625_v39 = vpop.f32.mrf.mxu3  ;;  %v1613_v1 = vadd.f32 %v1612_v37, %v1600_v36  ;;  %v1665_v56 = vand.u32 2147483648, %v1651_v35  ;;  %v1663_v62 = vand.u32 2147483647, %v1651_v35 }
 0x5f6   : > { %v1626_v29 = vadd.f32 %v1625_v39, %v1553_v23  ;;  %v1638_v28 = vpop.f32.mrf.mxu2  ;;  %vm1659_vm13 = vweird.f32 %v1651_v35 }
 0x5f7   : > { %v1601_v52 = vpop.f32.mrf.mxu0  ;;  %v1831_v43 = vmul.f32 -1.442695, %v1613_v1  ;;  %v1666_v47 = vor.u32 1.1754944e-38, %v1665_v56  ;;  %vm1664_vm15 = vcmp.eq.f32.partialorder %v1663_v62, 8.507059e+37 }
 0x5f8   : > { %v1639_v38 = vadd.f32 %v1638_v28, %v1626_v29 }
 0x5f9   : > { %2196 = vpow2.f32 %v1831_v43 }
 0x5fa   : > { %v1832_v40 = vmul.f32 -1.442695, %v1639_v38 }
 0x5fb   : > { %v2195_v10 = vpop.eup %2194 }
 0x5fc   : > { %v1655_v45 = vmul.f32 %v2195_v10, %v1651_v35  ;;  %2198 = vpow2.f32 %v1832_v40  ;;  %v1614_v31 = vpop.f32.mrf.mxu1  ;;  %vm1660_vm12 = vweird.f32 %v2195_v10 }
 0x5fd   : > { %v1627_v30 = vpop.f32.mrf.mxu3  ;;  %vm1661_vm14 = vmor %vm1659_vm13, %vm1660_vm12 }
 0x5fe   : > { %v1656_v25 = vsub.f32 1.0, %v1655_v45  ;;  %v1640_v53 = vpop.f32.mrf.mxu2 }
 0x5ff   : > { %v2197_v51 = vpop.eup %2196 }
 0x600   : > { %v1657_v3 = vmul.f32 %v2195_v10, %v1656_v25  ;;  %v1652_v63 = vadd.f32 1.0, %v2197_v51 }
 0x602   : > { %v2199_v5 = vpop.eup %2198  ;;  %v1658_v41 = vadd.f32 %v2195_v10, %v1657_v3  ;;  %2200 = vrcp.f32 %v1652_v63  ;;  %v1680_v57 = vand.u32 2147483648, %v1652_v63  ;;  %v1678_v12 = vand.u32 2147483647, %v1652_v63 }
 0x603   : > { %v1653_v54 = vadd.f32 1.0, %v2199_v5  ;;  %vm1674_vm1 = vweird.f32 %v1652_v63 }
 0x604   : > { %v1662_v60 = vsel %vm1661_vm14, %v2195_v10, %v1658_v41  ;;  %v1681_v0 = vor.u32 1.1754944e-38, %v1680_v57  ;;  %vm1679_vm4 = vcmp.eq.f32.partialorder %v1678_v12, 8.507059e+37 }
 0x605   : > { %v1667_v61 = vsel %vm1664_vm15, %v1666_v47, %v1662_v60  ;;  %2202 = vrcp.f32 %v1653_v54  ;;  %v1695_v20 = vand.u32 2147483648, %v1653_v54  ;;  %v1693_v48 = vand.u32 2147483647, %v1653_v54 }
 0x606   : > { %1699 = vst [vmem:[%s3098_s29] sm:$0xff] %v1667_v61  ;;  %vm1689_vm5 = vweird.f32 %v1653_v54 }
 0x607   : > { %v1696_v22 = vor.u32 1.1754944e-38, %v1695_v20  ;;  %vm1694_vm7 = vcmp.eq.f32.partialorder %v1693_v48, 8.507059e+37 }
 0x608   : > { %v2201_v2 = vpop.eup %2200 }
 0x609   : > { %v1670_v6 = vmul.f32 %v2201_v2, %v1652_v63  ;;  %vm1675_vm0 = vweird.f32 %v2201_v2 }
 0x60a   : > { %vm1676_vm2 = vmor %vm1674_vm1, %vm1675_vm0 }
 0x60b   : > { %v2203_v58 = vpop.eup %2202  ;;  %v1671_v8 = vsub.f32 1.0, %v1670_v6 }
 0x60c   : > { %v1685_v4 = vmul.f32 %v2203_v58, %v1653_v54  ;;  %vm1690_vm3 = vweird.f32 %v2203_v58 }
 0x60d   : > { %v1672_v11 = vmul.f32 %v2201_v2, %v1671_v8  ;;  %vm1691_vm6 = vmor %vm1689_vm5, %vm1690_vm3 }
 0x60e   : > { %v1686_v46 = vsub.f32 1.0, %v1685_v4 }
 0x60f   : > { %v1673_v13 = vadd.f32 %v2201_v2, %v1672_v11 }
 0x610   : > { %v1687_v17 = vmul.f32 %v2203_v58, %v1686_v46 }
 0x611   : > { %v1677_v50 = vsel %vm1676_vm2, %v2201_v2, %v1673_v13 }
 0x612   : > { %v1682_v9 = vsel %vm1679_vm4, %v1681_v0, %v1677_v50  ;;  %v1688_v15 = vadd.f32 %v2203_v58, %v1687_v17 }
 0x613   : > { %1700 = vst [vmem:[%s3098_s29 + $0x8] sm:$0xff] %v1682_v9 }
 0x614   : > { %v1692_v26 = vsel %vm1691_vm6, %v2203_v58, %v1688_v15 }
 0x615   : > { %v1697_v27 = vsel %vm1694_vm7, %v1696_v22, %v1692_v26 }
 0x616   : > { %1701 = vst [vmem:[%s3098_s29 + $0x10] sm:$0xff] %v1697_v27 }
 0x617 PF: > { %s28_s24 = sadd.s32 1, %s2210_s24  }
 0x618   : > { %p25_p4 = scmp.ge.s32.totalorder %s28_s24, 4  }
 0x61a   :  { %27 = sbr.rel (!%p25_p4) target bundleno = 3 (0x3), region = 129 }

</bundles_post_ra>
